<compile_context>
chip_gen: v7x
topology: tpu7x:2x2x1
jax: 0.10.0
libtpu: 0.0.40
codegen_flags: <defaults>
</compile_context>

<pallas_src>
import math

import jax
import jax.numpy as jnp
from jax import lax
from jax.experimental import pallas as pl
from jax.experimental.pallas import tpu as pltpu

# ----------------------------- model hyper-params -----------------------------
N_ROWS = 8          # "sequence length" seen by the MHA layers
IN_G = 32           # raw graph-representation feature size fed to graph_nn
IN_F = 24           # raw tabular-feature size fed to feature_nn
DIM = 16            # `dim` in Matini_Net
NUM_HEADS = 4
HEAD_DIM = DIM // NUM_HEADS
N_ATTENTION = 2
OUTPUT_DIM = 1
BN_EPS = 1e-5
BATCH = 4

_F32 = jnp.float32

# Row offsets inside the packed w_misc slab.
_R_ENC_END = IN_G + IN_F                          # 56   : block-diag [Wg ; Wf]
_R_PRE_END = _R_ENC_END + 4 * DIM                 # 120  : BN-folded pre_layers W
_R_PRED_END = _R_PRE_END + 2 * DIM                # 152  : lane-padded pred W
_R_MASK_END = _R_PRED_END + NUM_HEADS * N_ROWS    # 184  : head-mask constant


# --------------------------------- fused kernel --------------------------------
def fused_matini_kernel(x_ref, feat_ref, wm_ref, bm_ref, wa_ref, ba_ref, o_ref):
    L, H, D = N_ROWS, NUM_HEADS, DIM

    def dot(a, b):
        return jnp.dot(a, b, preferred_element_type=jnp.float32)

    def dot_tb(a, b):
        # a (M, K) . b (N, K) -> (M, N): MXU consumes the transposed operand,
        # no explicit XLU transpose on the critical path.
        return lax.dot_general(a, b, (((1,), (1,)), ((), ())),
                               preferred_element_type=jnp.float32)

    # ---- static views into the packed weight slabs (sublane-aligned slices) ----
    enc_w = wm_ref[0:_R_ENC_END, :]                     # (56, 2D) block-diag [Wg ; Wf]
    pre_w = wm_ref[_R_ENC_END:_R_PRE_END, :]            # (4D, 2D) BN folded
    pred_w = wm_ref[_R_PRE_END:_R_PRED_END, :]          # (2D, 2D) only lane 0 meaningful
    head_mask = wm_ref[_R_PRED_END:_R_MASK_END, 0:D]    # (H*L, D) constant

    bm = bm_ref[...]                                    # (3, 2D)
    enc_b = bm[0:1, :]
    pre_b = bm[1:2, :]
    pred_b = bm[2:3, :]

    # ---- graph_nn / feature_nn: single block-diagonal matmul + ReLU ----
    inp = jnp.concatenate([x_ref[0], feat_ref[0]], axis=1)       # (L, IN_G+IN_F)
    gf = jnp.maximum(dot(inp, enc_w) + enc_b, 0.0)                # (L, 2D)
    g, f = gf[:, 0:D], gf[:, D:2 * D]
    raw_g, raw_f = g, f

    def mha(layer, q_in, kv_in):
        w = wa_ref[layer]                                         # (D, 4D) [Wq*s|Wk|Wv|Wo]
        b = ba_ref[layer]                                         # (1, 4D)

        # Fused Q/K/V projection: one matmul on the sublane-stacked inputs.
        stacked = jnp.concatenate([q_in, kv_in], axis=0)          # (2L, D)
        proj = dot(stacked, w[:, 0:3 * D]) + b[:, 0:3 * D]        # (2L, 3D)
        q = proj[0:L, 0:D]                   # 1/sqrt(head_dim) pre-folded into Wq/bq
        k = proj[L:2 * L, D:2 * D]
        v = proj[L:2 * L, 2 * D:3 * D]

        # Head-pack queries along sublanes; per-head scores in one trans-B matmul.
        #   s[h*L+i, j] = <q_h[i], k_h[j]>   (softmax is a plain last-axis softmax)
        q_blk = jnp.concatenate([q] * H, axis=0) * head_mask      # (H*L, D)
        s = dot_tb(q_blk, k)                                      # (H*L, L)
        m = jnp.max(s, axis=-1, keepdims=True)
        p = jnp.exp(s - m)
        denom = jnp.sum(p, axis=-1, keepdims=True)                # XLU lane reduce
        attn = p * pl.reciprocal(denom, approx=True)              # EUP slot

        # Per-head outputs, then fold heads back onto their feature slots
        # (== torch's per-head concat along the embedding axis).
        ph = dot(attn, v) * head_mask                             # (H*L, D)
        heads = ph[0:L]
        for h in range(1, H):
            heads = heads + ph[h * L:(h + 1) * L]                 # (L, D)
        return dot(heads, w[:, 3 * D:4 * D]) + b[:, 3 * D:4 * D]  # out_proj

    for l in range(N_ATTENTION):                 # g = gmha(g, f, f)
        g = mha(l, g, f)
    for l in range(N_ATTENTION):                 # f = fmha(f, g, g)  (uses updated g)
        f = mha(N_ATTENTION + l, f, g)

    # pre_layers: one (L,4D)@(4D,2D) matmul; BN folded, Dropout = identity.
    cat = jnp.concatenate([raw_g, g, f, raw_f], axis=1)           # (L, 4D)
    hdn = jnp.maximum(dot(cat, pre_w) + pre_b, 0.0)               # (L, 2D)

    # pred_nn (weight lane-padded; only lane 0 carries the result)
    y = dot(hdn, pred_w) + pred_b                                 # (L, 2D)
    o_ref[0] = y[:, 0:OUTPUT_DIM]
    # TODO(synk): at large batch, emit the (L, 2D) pre-activation lane-dense and
    # finish the (2D, 1) head outside to avoid the 1-lane masked store.


# ------------------------------ packing (once, NOT jitted) ----------------------
def pack_inference_params(params):
    """Fold eval-mode constants (attention scale, BatchNorm) and pack all weights
    into 4 slabs.  Runs once at setup; the cached tuple is reused by every call."""
    scale = 1.0 / math.sqrt(HEAD_DIM)
    mhas = list(params["gmhas"]) + list(params["fmhas"])
    w_mha = jnp.stack([jnp.concatenate(
        [p["wq"] * scale, p["wk"], p["wv"], p["wo"]], axis=1) for p in mhas])   # (4, D, 4D)
    b_mha = jnp.stack([jnp.concatenate(
        [p["bq"] * scale, p["bk"], p["bv"], p["bo"]], axis=1) for p in mhas])   # (4, 1, 4D)

    enc_w = jnp.zeros((IN_G + IN_F, 2 * DIM), _F32)
    enc_w = enc_w.at[0:IN_G, 0:DIM].set(params["graph_nn"]["w"])
    enc_w = enc_w.at[IN_G:, DIM:].set(params["feature_nn"]["w"])
    enc_b = jnp.concatenate([params["graph_nn"]["b"], params["feature_nn"]["b"]], axis=1)

    pre = params["pre_layers"]
    s = pre["gamma"] * lax.rsqrt(pre["var"] + BN_EPS)
    pre_w = pre["w"] * s                                          # column-wise BN fold
    pre_b = (pre["b"] - pre["mean"]) * s + pre["beta"]

    pred_w = jnp.zeros((2 * DIM, 2 * DIM), _F32).at[:, 0:OUTPUT_DIM].set(
        params["pred_nn"]["w"])
    pred_b = jnp.zeros((1, 2 * DIM), _F32).at[:, 0:OUTPUT_DIM].set(
        params["pred_nn"]["b"])

    hl = NUM_HEADS * N_ROWS
    head_mask = ((jnp.arange(hl)[:, None] // N_ROWS)
                 == (jnp.arange(DIM)[None, :] // HEAD_DIM)).astype(_F32)
    head_mask = jnp.zeros((hl, 2 * DIM), _F32).at[:, 0:DIM].set(head_mask)

    w_misc = jnp.concatenate([enc_w, pre_w, pred_w, head_mask], axis=0)   # (184, 2D)
    b_misc = jnp.concatenate([enc_b, pre_b, pred_b], axis=0)              # (3, 2D)
    return (w_misc, b_misc, w_mha, b_mha)


# ------------------------------ jitted forward ----------------------------------
@jax.jit
def matini_net_forward(packed, data_x, data_feat):
    """Batched eval forward: grid over samples; weight slabs DMA once and stay
    resident in VMEM (constant index_map)."""
    w_misc, b_misc, w_mha, b_mha = packed
    batch = data_x.shape[0]
    return pl.pallas_call(
        fused_matini_kernel,
        out_shape=jax.ShapeDtypeStruct((batch, N_ROWS, OUTPUT_DIM), _F32),
        grid=(batch,),
        in_specs=[
            pl.BlockSpec((1, N_ROWS, IN_G), lambda b: (b, 0, 0)),
            pl.BlockSpec((1, N_ROWS, IN_F), lambda b: (b, 0, 0)),
            pl.BlockSpec(w_misc.shape, lambda b: (0, 0)),
            pl.BlockSpec(b_misc.shape, lambda b: (0, 0)),
            pl.BlockSpec(w_mha.shape, lambda b: (0, 0, 0)),
            pl.BlockSpec(b_mha.shape, lambda b: (0, 0, 0)),
        ],
        out_specs=pl.BlockSpec((1, N_ROWS, OUTPUT_DIM), lambda b: (b, 0, 0)),
        compiler_params=pltpu.CompilerParams(dimension_semantics=("parallel",)),
    )(data_x, data_feat, w_misc, b_misc, w_mha, b_mha)


# ------------------------------ parameter setup --------------------------------
def _init_linear(key, in_dim, out_dim):
    kw, kb = jax.random.split(key)
    return {"w": jax.random.normal(kw, (in_dim, out_dim), _F32) * 0.1,   # stored (in, out)
            "b": jax.random.normal(kb, (1, out_dim), _F32) * 0.01}


def _init_mha(key):
    # Mirrors nn.MultiheadAttention: in_proj_weight (3E,E), in_proj_bias (3E,),
    # out_proj.weight (E,E), out_proj.bias (E,).  Stored pre-transposed.
    k1, k2, k3, k4 = jax.random.split(key, 4)
    in_proj_w = jax.random.normal(k1, (3 * DIM, DIM), _F32) * 0.1
    in_proj_b = jax.random.normal(k2, (3 * DIM,), _F32) * 0.01
    out_w = jax.random.normal(k3, (DIM, DIM), _F32) * 0.1
    out_b = jax.random.normal(k4, (DIM,), _F32) * 0.01
    return {
        "wq": in_proj_w[0 * DIM:1 * DIM].T,
        "wk": in_proj_w[1 * DIM:2 * DIM].T,
        "wv": in_proj_w[2 * DIM:3 * DIM].T,
        "bq": in_proj_b[0 * DIM:1 * DIM].reshape(1, DIM),
        "bk": in_proj_b[1 * DIM:2 * DIM].reshape(1, DIM),
        "bv": in_proj_b[2 * DIM:3 * DIM].reshape(1, DIM),
        "wo": out_w.T,
        "bo": out_b.reshape(1, DIM),
    }


def init_params(key):
    keys = jax.random.split(key, 8)
    graph_nn = _init_linear(keys[0], IN_G, DIM)
    feature_nn = _init_linear(keys[1], IN_F, DIM)
    gmhas = [_init_mha(keys[2]), _init_mha(keys[3])][:N_ATTENTION]
    fmhas = [_init_mha(keys[4]), _init_mha(keys[5])][:N_ATTENTION]
    pre = _init_linear(keys[6], 4 * DIM, 2 * DIM)
    pre_layers = {
        "w": pre["w"], "b": pre["b"],
        "gamma": jnp.ones((1, 2 * DIM), _F32),
        "beta": jnp.zeros((1, 2 * DIM), _F32),
        "mean": jnp.zeros((1, 2 * DIM), _F32),
        "var": jnp.ones((1, 2 * DIM), _F32),
    }
    pred_nn = _init_linear(keys[7], 2 * DIM, OUTPUT_DIM)
    return {"graph_nn": graph_nn, "feature_nn": feature_nn,
            "gmhas": gmhas, "fmhas": fmhas,
            "pre_layers": pre_layers, "pred_nn": pred_nn}


# -------------------------- pure-JAX reference (checking) ----------------------
def _mha_ref(q_in, kv_in, p):
    q = q_in @ p["wq"] + p["bq"]
    k = kv_in @ p["wk"] + p["bk"]
    v = kv_in @ p["wv"] + p["bv"]
    scale = 1.0 / math.sqrt(HEAD_DIM)
    outs = []
    for h in range(NUM_HEADS):
        lo, hi = h * HEAD_DIM, (h + 1) * HEAD_DIM
        s = (q[:, lo:hi] @ k[:, lo:hi].T) * scale
        a = jax.nn.softmax(s, axis=-1)
        outs.append(a @ v[:, lo:hi])
    return jnp.concatenate(outs, axis=1) @ p["wo"] + p["bo"]


def matini_net_reference(params, data_x, data_feat):
    g = jax.nn.relu(data_x @ params["graph_nn"]["w"] + params["graph_nn"]["b"])
    f = jax.nn.relu(data_feat @ params["feature_nn"]["w"] + params["feature_nn"]["b"])
    raw_g, raw_f = g, f
    for p in params["gmhas"]:
        g = _mha_ref(g, f, p)
    for p in params["fmhas"]:
        f = _mha_ref(f, g, p)
    x = jnp.concatenate([raw_g, g, f, raw_f], axis=1)
    pre = params["pre_layers"]
    y = x @ pre["w"] + pre["b"]
    y = (y - pre["mean"]) * pre["gamma"] * lax.rsqrt(pre["var"] + BN_EPS) + pre["beta"]
    y = jax.nn.relu(y)
    return y @ params["pred_nn"]["w"] + params["pred_nn"]["b"]


# ----------------------------------- main ---------------------------------------
if __name__ == "__main__":
    root = jax.random.PRNGKey(0)
    k_params, k_x, k_feat = jax.random.split(root, 3)

    params = init_params(k_params)
    data_x = jax.random.normal(k_x, (BATCH, N_ROWS, IN_G), _F32)      # consumed by graph_nn
    data_feat = jax.random.normal(k_feat, (BATCH, N_ROWS, IN_F), _F32)  # data.feat

    packed = pack_inference_params(params)           # pack ONCE, outside the jit
    out = jax.block_until_ready(matini_net_forward(packed, data_x, data_feat))
    assert out.shape == (BATCH, N_ROWS, OUTPUT_DIM), out.shape
    assert bool(jnp.all(jnp.isfinite(out)))

    ref = jax.vmap(lambda xx, ff: matini_net_reference(params, xx, ff))(data_x, data_feat)
    max_err = float(jnp.max(jnp.abs(out - ref)))
    assert max_err < 1e-2, f"kernel/reference mismatch: max abs err = {max_err}"

    print("KERNEL_OK")
</pallas_src>

<mosaic_0001>
module attributes {stable_mosaic.version = 11 : i64} {
  func.func @fused_matini_kernel(%arg0: i32, %arg1: memref<1x8x32xf32, #tpu.memory_space<vmem>>, %arg2: memref<1x8x24xf32, #tpu.memory_space<vmem>>, %arg3: memref<184x32xf32, #tpu.memory_space<vmem>>, %arg4: memref<3x32xf32, #tpu.memory_space<vmem>>, %arg5: memref<4x16x64xf32, #tpu.memory_space<vmem>>, %arg6: memref<4x1x64xf32, #tpu.memory_space<vmem>>, %arg7: memref<1x8x1xf32, #tpu.memory_space<vmem>>) attributes {dimension_semantics = [#tpu.dimension_semantics<parallel>], iteration_bounds = array<i64: 4>, scalar_prefetch = 0 : i64, scratch_operands = 0 : i64, tpu.core_type = #tpu.core_type<tc>, window_params = [{transform_indices = @transform_0, window_bounds = array<i64: 1, 8, 32>}, {transform_indices = @transform_1, window_bounds = array<i64: 1, 8, 24>}, {pipeline_mode = #tpu.pipeline_mode<synchronous>, transform_indices = @transform_2, window_bounds = array<i64: 184, 32>}, {pipeline_mode = #tpu.pipeline_mode<synchronous>, transform_indices = @transform_3, window_bounds = array<i64: 3, 32>}, {pipeline_mode = #tpu.pipeline_mode<synchronous>, transform_indices = @transform_4, window_bounds = array<i64: 4, 16, 64>}, {pipeline_mode = #tpu.pipeline_mode<synchronous>, transform_indices = @transform_5, window_bounds = array<i64: 4, 1, 64>}, {transform_indices = @transform_6, window_bounds = array<i64: 1, 8, 1>}]} {
    %c0 = arith.constant 0 : index
    %c0_0 = arith.constant 0 : index
    %0 = vector.load %arg3[%c0, %c0_0] : memref<184x32xf32, #tpu.memory_space<vmem>>, vector<56x32xf32>
    %c56 = arith.constant 56 : index
    %c0_1 = arith.constant 0 : index
    %1 = vector.load %arg3[%c56, %c0_1] : memref<184x32xf32, #tpu.memory_space<vmem>>, vector<64x32xf32>
    %c120 = arith.constant 120 : index
    %c0_2 = arith.constant 0 : index
    %2 = vector.load %arg3[%c120, %c0_2] : memref<184x32xf32, #tpu.memory_space<vmem>>, vector<32x32xf32>
    %c152 = arith.constant 152 : index
    %c0_3 = arith.constant 0 : index
    %3 = vector.load %arg3[%c152, %c0_3] : memref<184x32xf32, #tpu.memory_space<vmem>>, vector<32x16xf32>
    %c0_4 = arith.constant 0 : index
    %c0_5 = arith.constant 0 : index
    %4 = vector.load %arg4[%c0_4, %c0_5] : memref<3x32xf32, #tpu.memory_space<vmem>>, vector<3x32xf32>
    %5 = vector.extract_strided_slice %4 {offsets = [0, 0], sizes = [1, 32], strides = [1, 1]} : vector<3x32xf32> to vector<1x32xf32>
    %6 = vector.extract_strided_slice %4 {offsets = [1, 0], sizes = [1, 32], strides = [1, 1]} : vector<3x32xf32> to vector<1x32xf32>
    %7 = vector.extract_strided_slice %4 {offsets = [2, 0], sizes = [1, 32], strides = [1, 1]} : vector<3x32xf32> to vector<1x32xf32>
    %c0_6 = arith.constant 0 : index
    %c0_7 = arith.constant 0 : index
    %c0_8 = arith.constant 0 : index
    %8 = vector.load %arg1[%c0_6, %c0_7, %c0_8] : memref<1x8x32xf32, #tpu.memory_space<vmem>>, vector<1x8x32xf32>
    %9 = vector.shape_cast %8 : vector<1x8x32xf32> to vector<8x32xf32>
    %c0_9 = arith.constant 0 : index
    %c0_10 = arith.constant 0 : index
    %c0_11 = arith.constant 0 : index
    %10 = vector.load %arg2[%c0_9, %c0_10, %c0_11] : memref<1x8x24xf32, #tpu.memory_space<vmem>>, vector<1x8x24xf32>
    %11 = vector.shape_cast %10 : vector<1x8x24xf32> to vector<8x24xf32>
    %12 = tpu.concatenate %9, %11 in 1 : vector<8x32xf32>, vector<8x24xf32> -> vector<8x56xf32>
    %cst = arith.constant dense<0.000000e+00> : vector<8x32xf32>
    %13 = tpu.matmul %12, %0, %cst {dimension_numbers = #tpu.dot_dimension_numbers<[1], [0], [0], [1], [0, 0, 1, 1], [], []>} : vector<8x56xf32>, vector<56x32xf32>, vector<8x32xf32> -> vector<8x32xf32>
    %14 = vector.broadcast %5 : vector<1x32xf32> to vector<8x32xf32>
    %15 = arith.addf %13, %14 : vector<8x32xf32>
    %cst_12 = arith.constant 0.000000e+00 : f32
    %16 = vector.broadcast %cst_12 : f32 to vector<8x32xf32>
    %17 = arith.maximumf %15, %16 : vector<8x32xf32>
    %18 = vector.extract_strided_slice %17 {offsets = [0, 0], sizes = [8, 16], strides = [1, 1]} : vector<8x32xf32> to vector<8x16xf32>
    %19 = vector.extract_strided_slice %17 {offsets = [0, 16], sizes = [8, 16], strides = [1, 1]} : vector<8x32xf32> to vector<8x16xf32>
    %c0_13 = arith.constant 0 : index
    %c0_14 = arith.constant 0 : index
    %c0_15 = arith.constant 0 : index
    %20 = vector.load %arg5[%c0_13, %c0_14, %c0_15] : memref<4x16x64xf32, #tpu.memory_space<vmem>>, vector<1x16x64xf32>
    %21 = vector.shape_cast %20 : vector<1x16x64xf32> to vector<16x64xf32>
    %c0_16 = arith.constant 0 : index
    %c0_17 = arith.constant 0 : index
    %c0_18 = arith.constant 0 : index
    %22 = vector.load %arg6[%c0_16, %c0_17, %c0_18] : memref<4x1x64xf32, #tpu.memory_space<vmem>>, vector<1x1x64xf32>
    %23 = vector.shape_cast %22 : vector<1x1x64xf32> to vector<1x64xf32>
    %24 = tpu.concatenate %18, %19 in 0 : vector<8x16xf32>, vector<8x16xf32> -> vector<16x16xf32>
    %25 = vector.extract_strided_slice %21 {offsets = [0, 0], sizes = [16, 48], strides = [1, 1]} : vector<16x64xf32> to vector<16x48xf32>
    %cst_19 = arith.constant dense<0.000000e+00> : vector<16x48xf32>
    %26 = tpu.matmul %24, %25, %cst_19 {dimension_numbers = #tpu.dot_dimension_numbers<[1], [0], [0], [1], [0, 0, 1, 1], [], []>} : vector<16x16xf32>, vector<16x48xf32>, vector<16x48xf32> -> vector<16x48xf32>
    %27 = vector.extract_strided_slice %23 {offsets = [0, 0], sizes = [1, 48], strides = [1, 1]} : vector<1x64xf32> to vector<1x48xf32>
    %28 = vector.broadcast %27 : vector<1x48xf32> to vector<16x48xf32>
    %29 = arith.addf %26, %28 : vector<16x48xf32>
    %30 = vector.extract_strided_slice %29 {offsets = [0, 0], sizes = [8, 16], strides = [1, 1]} : vector<16x48xf32> to vector<8x16xf32>
    %31 = vector.extract_strided_slice %29 {offsets = [8, 16], sizes = [8, 16], strides = [1, 1]} : vector<16x48xf32> to vector<8x16xf32>
    %32 = vector.extract_strided_slice %29 {offsets = [8, 32], sizes = [8, 16], strides = [1, 1]} : vector<16x48xf32> to vector<8x16xf32>
    %33 = tpu.concatenate %30, %30, %30, %30 in 0 : vector<8x16xf32>, vector<8x16xf32>, vector<8x16xf32>, vector<8x16xf32> -> vector<32x16xf32>
    %34 = arith.mulf %33, %3 : vector<32x16xf32>
    %cst_20 = arith.constant dense<0.000000e+00> : vector<32x8xf32>
    %35 = tpu.matmul %34, %31, %cst_20 {dimension_numbers = #tpu.dot_dimension_numbers<[1], [1], [0], [0], [0, 0, 1, 0], [], []>} : vector<32x16xf32>, vector<8x16xf32>, vector<32x8xf32> -> vector<32x8xf32>
    %cst_21 = arith.constant dense<0xFF800000> : vector<32xf32>
    %36 = vector.multi_reduction <maximumf>, %35, %cst_21 [1] : vector<32x8xf32> to vector<32xf32>
    %37 = vector.shape_cast %36 : vector<32xf32> to vector<32x1xf32>
    %38 = vector.broadcast %37 : vector<32x1xf32> to vector<32x8xf32>
    %39 = arith.subf %35, %38 : vector<32x8xf32>
    %40 = math.exp %39 : vector<32x8xf32>
    %cst_22 = arith.constant dense<0.000000e+00> : vector<32xf32>
    %41 = vector.multi_reduction <add>, %40, %cst_22 [1] : vector<32x8xf32> to vector<32xf32>
    %42 = vector.shape_cast %41 : vector<32xf32> to vector<32x1xf32>
    %43 = tpu.reciprocal %42 {approx = true} : vector<32x1xf32> -> vector<32x1xf32>
    %44 = vector.broadcast %43 : vector<32x1xf32> to vector<32x8xf32>
    %45 = arith.mulf %40, %44 : vector<32x8xf32>
    %cst_23 = arith.constant dense<0.000000e+00> : vector<32x16xf32>
    %46 = tpu.matmul %45, %32, %cst_23 {dimension_numbers = #tpu.dot_dimension_numbers<[1], [0], [0], [1], [0, 0, 1, 1], [], []>} : vector<32x8xf32>, vector<8x16xf32>, vector<32x16xf32> -> vector<32x16xf32>
    %47 = arith.mulf %46, %3 : vector<32x16xf32>
    %48 = vector.extract_strided_slice %47 {offsets = [0, 0], sizes = [8, 16], strides = [1, 1]} : vector<32x16xf32> to vector<8x16xf32>
    %49 = vector.extract_strided_slice %47 {offsets = [8, 0], sizes = [8, 16], strides = [1, 1]} : vector<32x16xf32> to vector<8x16xf32>
    %50 = arith.addf %48, %49 : vector<8x16xf32>
    %51 = vector.extract_strided_slice %47 {offsets = [16, 0], sizes = [8, 16], strides = [1, 1]} : vector<32x16xf32> to vector<8x16xf32>
    %52 = arith.addf %50, %51 : vector<8x16xf32>
    %53 = vector.extract_strided_slice %47 {offsets = [24, 0], sizes = [8, 16], strides = [1, 1]} : vector<32x16xf32> to vector<8x16xf32>
    %54 = arith.addf %52, %53 : vector<8x16xf32>
    %55 = vector.extract_strided_slice %21 {offsets = [0, 48], sizes = [16, 16], strides = [1, 1]} : vector<16x64xf32> to vector<16x16xf32>
    %cst_24 = arith.constant dense<0.000000e+00> : vector<8x16xf32>
    %56 = tpu.matmul %54, %55, %cst_24 {dimension_numbers = #tpu.dot_dimension_numbers<[1], [0], [0], [1], [0, 0, 1, 1], [], []>} : vector<8x16xf32>, vector<16x16xf32>, vector<8x16xf32> -> vector<8x16xf32>
    %57 = vector.extract_strided_slice %23 {offsets = [0, 48], sizes = [1, 16], strides = [1, 1]} : vector<1x64xf32> to vector<1x16xf32>
    %58 = vector.broadcast %57 : vector<1x16xf32> to vector<8x16xf32>
    %59 = arith.addf %56, %58 : vector<8x16xf32>
    %c1 = arith.constant 1 : index
    %c0_25 = arith.constant 0 : index
    %c0_26 = arith.constant 0 : index
    %60 = vector.load %arg5[%c1, %c0_25, %c0_26] : memref<4x16x64xf32, #tpu.memory_space<vmem>>, vector<1x16x64xf32>
    %61 = vector.shape_cast %60 : vector<1x16x64xf32> to vector<16x64xf32>
    %c1_27 = arith.constant 1 : index
    %c0_28 = arith.constant 0 : index
    %c0_29 = arith.constant 0 : index
    %62 = vector.load %arg6[%c1_27, %c0_28, %c0_29] : memref<4x1x64xf32, #tpu.memory_space<vmem>>, vector<1x1x64xf32>
    %63 = vector.shape_cast %62 : vector<1x1x64xf32> to vector<1x64xf32>
    %64 = tpu.concatenate %59, %19 in 0 : vector<8x16xf32>, vector<8x16xf32> -> vector<16x16xf32>
    %65 = vector.extract_strided_slice %61 {offsets = [0, 0], sizes = [16, 48], strides = [1, 1]} : vector<16x64xf32> to vector<16x48xf32>
    %cst_30 = arith.constant dense<0.000000e+00> : vector<16x48xf32>
    %66 = tpu.matmul %64, %65, %cst_30 {dimension_numbers = #tpu.dot_dimension_numbers<[1], [0], [0], [1], [0, 0, 1, 1], [], []>} : vector<16x16xf32>, vector<16x48xf32>, vector<16x48xf32> -> vector<16x48xf32>
    %67 = vector.extract_strided_slice %63 {offsets = [0, 0], sizes = [1, 48], strides = [1, 1]} : vector<1x64xf32> to vector<1x48xf32>
    %68 = vector.broadcast %67 : vector<1x48xf32> to vector<16x48xf32>
    %69 = arith.addf %66, %68 : vector<16x48xf32>
    %70 = vector.extract_strided_slice %69 {offsets = [0, 0], sizes = [8, 16], strides = [1, 1]} : vector<16x48xf32> to vector<8x16xf32>
    %71 = vector.extract_strided_slice %69 {offsets = [8, 16], sizes = [8, 16], strides = [1, 1]} : vector<16x48xf32> to vector<8x16xf32>
    %72 = vector.extract_strided_slice %69 {offsets = [8, 32], sizes = [8, 16], strides = [1, 1]} : vector<16x48xf32> to vector<8x16xf32>
    %73 = tpu.concatenate %70, %70, %70, %70 in 0 : vector<8x16xf32>, vector<8x16xf32>, vector<8x16xf32>, vector<8x16xf32> -> vector<32x16xf32>
    %74 = arith.mulf %73, %3 : vector<32x16xf32>
    %cst_31 = arith.constant dense<0.000000e+00> : vector<32x8xf32>
    %75 = tpu.matmul %74, %71, %cst_31 {dimension_numbers = #tpu.dot_dimension_numbers<[1], [1], [0], [0], [0, 0, 1, 0], [], []>} : vector<32x16xf32>, vector<8x16xf32>, vector<32x8xf32> -> vector<32x8xf32>
    %cst_32 = arith.constant dense<0xFF800000> : vector<32xf32>
    %76 = vector.multi_reduction <maximumf>, %75, %cst_32 [1] : vector<32x8xf32> to vector<32xf32>
    %77 = vector.shape_cast %76 : vector<32xf32> to vector<32x1xf32>
    %78 = vector.broadcast %77 : vector<32x1xf32> to vector<32x8xf32>
    %79 = arith.subf %75, %78 : vector<32x8xf32>
    %80 = math.exp %79 : vector<32x8xf32>
    %cst_33 = arith.constant dense<0.000000e+00> : vector<32xf32>
    %81 = vector.multi_reduction <add>, %80, %cst_33 [1] : vector<32x8xf32> to vector<32xf32>
    %82 = vector.shape_cast %81 : vector<32xf32> to vector<32x1xf32>
    %83 = tpu.reciprocal %82 {approx = true} : vector<32x1xf32> -> vector<32x1xf32>
    %84 = vector.broadcast %83 : vector<32x1xf32> to vector<32x8xf32>
    %85 = arith.mulf %80, %84 : vector<32x8xf32>
    %cst_34 = arith.constant dense<0.000000e+00> : vector<32x16xf32>
    %86 = tpu.matmul %85, %72, %cst_34 {dimension_numbers = #tpu.dot_dimension_numbers<[1], [0], [0], [1], [0, 0, 1, 1], [], []>} : vector<32x8xf32>, vector<8x16xf32>, vector<32x16xf32> -> vector<32x16xf32>
    %87 = arith.mulf %86, %3 : vector<32x16xf32>
    %88 = vector.extract_strided_slice %87 {offsets = [0, 0], sizes = [8, 16], strides = [1, 1]} : vector<32x16xf32> to vector<8x16xf32>
    %89 = vector.extract_strided_slice %87 {offsets = [8, 0], sizes = [8, 16], strides = [1, 1]} : vector<32x16xf32> to vector<8x16xf32>
    %90 = arith.addf %88, %89 : vector<8x16xf32>
    %91 = vector.extract_strided_slice %87 {offsets = [16, 0], sizes = [8, 16], strides = [1, 1]} : vector<32x16xf32> to vector<8x16xf32>
    %92 = arith.addf %90, %91 : vector<8x16xf32>
    %93 = vector.extract_strided_slice %87 {offsets = [24, 0], sizes = [8, 16], strides = [1, 1]} : vector<32x16xf32> to vector<8x16xf32>
    %94 = arith.addf %92, %93 : vector<8x16xf32>
    %95 = vector.extract_strided_slice %61 {offsets = [0, 48], sizes = [16, 16], strides = [1, 1]} : vector<16x64xf32> to vector<16x16xf32>
    %cst_35 = arith.constant dense<0.000000e+00> : vector<8x16xf32>
    %96 = tpu.matmul %94, %95, %cst_35 {dimension_numbers = #tpu.dot_dimension_numbers<[1], [0], [0], [1], [0, 0, 1, 1], [], []>} : vector<8x16xf32>, vector<16x16xf32>, vector<8x16xf32> -> vector<8x16xf32>
    %97 = vector.extract_strided_slice %63 {offsets = [0, 48], sizes = [1, 16], strides = [1, 1]} : vector<1x64xf32> to vector<1x16xf32>
    %98 = vector.broadcast %97 : vector<1x16xf32> to vector<8x16xf32>
    %99 = arith.addf %96, %98 : vector<8x16xf32>
    %c2 = arith.constant 2 : index
    %c0_36 = arith.constant 0 : index
    %c0_37 = arith.constant 0 : index
    %100 = vector.load %arg5[%c2, %c0_36, %c0_37] : memref<4x16x64xf32, #tpu.memory_space<vmem>>, vector<1x16x64xf32>
    %101 = vector.shape_cast %100 : vector<1x16x64xf32> to vector<16x64xf32>
    %c2_38 = arith.constant 2 : index
    %c0_39 = arith.constant 0 : index
    %c0_40 = arith.constant 0 : index
    %102 = vector.load %arg6[%c2_38, %c0_39, %c0_40] : memref<4x1x64xf32, #tpu.memory_space<vmem>>, vector<1x1x64xf32>
    %103 = vector.shape_cast %102 : vector<1x1x64xf32> to vector<1x64xf32>
    %104 = tpu.concatenate %19, %99 in 0 : vector<8x16xf32>, vector<8x16xf32> -> vector<16x16xf32>
    %105 = vector.extract_strided_slice %101 {offsets = [0, 0], sizes = [16, 48], strides = [1, 1]} : vector<16x64xf32> to vector<16x48xf32>
    %cst_41 = arith.constant dense<0.000000e+00> : vector<16x48xf32>
    %106 = tpu.matmul %104, %105, %cst_41 {dimension_numbers = #tpu.dot_dimension_numbers<[1], [0], [0], [1], [0, 0, 1, 1], [], []>} : vector<16x16xf32>, vector<16x48xf32>, vector<16x48xf32> -> vector<16x48xf32>
    %107 = vector.extract_strided_slice %103 {offsets = [0, 0], sizes = [1, 48], strides = [1, 1]} : vector<1x64xf32> to vector<1x48xf32>
    %108 = vector.broadcast %107 : vector<1x48xf32> to vector<16x48xf32>
    %109 = arith.addf %106, %108 : vector<16x48xf32>
    %110 = vector.extract_strided_slice %109 {offsets = [0, 0], sizes = [8, 16], strides = [1, 1]} : vector<16x48xf32> to vector<8x16xf32>
    %111 = vector.extract_strided_slice %109 {offsets = [8, 16], sizes = [8, 16], strides = [1, 1]} : vector<16x48xf32> to vector<8x16xf32>
    %112 = vector.extract_strided_slice %109 {offsets = [8, 32], sizes = [8, 16], strides = [1, 1]} : vector<16x48xf32> to vector<8x16xf32>
    %113 = tpu.concatenate %110, %110, %110, %110 in 0 : vector<8x16xf32>, vector<8x16xf32>, vector<8x16xf32>, vector<8x16xf32> -> vector<32x16xf32>
    %114 = arith.mulf %113, %3 : vector<32x16xf32>
    %cst_42 = arith.constant dense<0.000000e+00> : vector<32x8xf32>
    %115 = tpu.matmul %114, %111, %cst_42 {dimension_numbers = #tpu.dot_dimension_numbers<[1], [1], [0], [0], [0, 0, 1, 0], [], []>} : vector<32x16xf32>, vector<8x16xf32>, vector<32x8xf32> -> vector<32x8xf32>
    %cst_43 = arith.constant dense<0xFF800000> : vector<32xf32>
    %116 = vector.multi_reduction <maximumf>, %115, %cst_43 [1] : vector<32x8xf32> to vector<32xf32>
    %117 = vector.shape_cast %116 : vector<32xf32> to vector<32x1xf32>
    %118 = vector.broadcast %117 : vector<32x1xf32> to vector<32x8xf32>
    %119 = arith.subf %115, %118 : vector<32x8xf32>
    %120 = math.exp %119 : vector<32x8xf32>
    %cst_44 = arith.constant dense<0.000000e+00> : vector<32xf32>
    %121 = vector.multi_reduction <add>, %120, %cst_44 [1] : vector<32x8xf32> to vector<32xf32>
    %122 = vector.shape_cast %121 : vector<32xf32> to vector<32x1xf32>
    %123 = tpu.reciprocal %122 {approx = true} : vector<32x1xf32> -> vector<32x1xf32>
    %124 = vector.broadcast %123 : vector<32x1xf32> to vector<32x8xf32>
    %125 = arith.mulf %120, %124 : vector<32x8xf32>
    %cst_45 = arith.constant dense<0.000000e+00> : vector<32x16xf32>
    %126 = tpu.matmul %125, %112, %cst_45 {dimension_numbers = #tpu.dot_dimension_numbers<[1], [0], [0], [1], [0, 0, 1, 1], [], []>} : vector<32x8xf32>, vector<8x16xf32>, vector<32x16xf32> -> vector<32x16xf32>
    %127 = arith.mulf %126, %3 : vector<32x16xf32>
    %128 = vector.extract_strided_slice %127 {offsets = [0, 0], sizes = [8, 16], strides = [1, 1]} : vector<32x16xf32> to vector<8x16xf32>
    %129 = vector.extract_strided_slice %127 {offsets = [8, 0], sizes = [8, 16], strides = [1, 1]} : vector<32x16xf32> to vector<8x16xf32>
    %130 = arith.addf %128, %129 : vector<8x16xf32>
    %131 = vector.extract_strided_slice %127 {offsets = [16, 0], sizes = [8, 16], strides = [1, 1]} : vector<32x16xf32> to vector<8x16xf32>
    %132 = arith.addf %130, %131 : vector<8x16xf32>
    %133 = vector.extract_strided_slice %127 {offsets = [24, 0], sizes = [8, 16], strides = [1, 1]} : vector<32x16xf32> to vector<8x16xf32>
    %134 = arith.addf %132, %133 : vector<8x16xf32>
    %135 = vector.extract_strided_slice %101 {offsets = [0, 48], sizes = [16, 16], strides = [1, 1]} : vector<16x64xf32> to vector<16x16xf32>
    %cst_46 = arith.constant dense<0.000000e+00> : vector<8x16xf32>
    %136 = tpu.matmul %134, %135, %cst_46 {dimension_numbers = #tpu.dot_dimension_numbers<[1], [0], [0], [1], [0, 0, 1, 1], [], []>} : vector<8x16xf32>, vector<16x16xf32>, vector<8x16xf32> -> vector<8x16xf32>
    %137 = vector.extract_strided_slice %103 {offsets = [0, 48], sizes = [1, 16], strides = [1, 1]} : vector<1x64xf32> to vector<1x16xf32>
    %138 = vector.broadcast %137 : vector<1x16xf32> to vector<8x16xf32>
    %139 = arith.addf %136, %138 : vector<8x16xf32>
    %c3 = arith.constant 3 : index
    %c0_47 = arith.constant 0 : index
    %c0_48 = arith.constant 0 : index
    %140 = vector.load %arg5[%c3, %c0_47, %c0_48] : memref<4x16x64xf32, #tpu.memory_space<vmem>>, vector<1x16x64xf32>
    %141 = vector.shape_cast %140 : vector<1x16x64xf32> to vector<16x64xf32>
    %c3_49 = arith.constant 3 : index
    %c0_50 = arith.constant 0 : index
    %c0_51 = arith.constant 0 : index
    %142 = vector.load %arg6[%c3_49, %c0_50, %c0_51] : memref<4x1x64xf32, #tpu.memory_space<vmem>>, vector<1x1x64xf32>
    %143 = vector.shape_cast %142 : vector<1x1x64xf32> to vector<1x64xf32>
    %144 = tpu.concatenate %139, %99 in 0 : vector<8x16xf32>, vector<8x16xf32> -> vector<16x16xf32>
    %145 = vector.extract_strided_slice %141 {offsets = [0, 0], sizes = [16, 48], strides = [1, 1]} : vector<16x64xf32> to vector<16x48xf32>
    %cst_52 = arith.constant dense<0.000000e+00> : vector<16x48xf32>
    %146 = tpu.matmul %144, %145, %cst_52 {dimension_numbers = #tpu.dot_dimension_numbers<[1], [0], [0], [1], [0, 0, 1, 1], [], []>} : vector<16x16xf32>, vector<16x48xf32>, vector<16x48xf32> -> vector<16x48xf32>
    %147 = vector.extract_strided_slice %143 {offsets = [0, 0], sizes = [1, 48], strides = [1, 1]} : vector<1x64xf32> to vector<1x48xf32>
    %148 = vector.broadcast %147 : vector<1x48xf32> to vector<16x48xf32>
    %149 = arith.addf %146, %148 : vector<16x48xf32>
    %150 = vector.extract_strided_slice %149 {offsets = [0, 0], sizes = [8, 16], strides = [1, 1]} : vector<16x48xf32> to vector<8x16xf32>
    %151 = vector.extract_strided_slice %149 {offsets = [8, 16], sizes = [8, 16], strides = [1, 1]} : vector<16x48xf32> to vector<8x16xf32>
    %152 = vector.extract_strided_slice %149 {offsets = [8, 32], sizes = [8, 16], strides = [1, 1]} : vector<16x48xf32> to vector<8x16xf32>
    %153 = tpu.concatenate %150, %150, %150, %150 in 0 : vector<8x16xf32>, vector<8x16xf32>, vector<8x16xf32>, vector<8x16xf32> -> vector<32x16xf32>
    %154 = arith.mulf %153, %3 : vector<32x16xf32>
    %cst_53 = arith.constant dense<0.000000e+00> : vector<32x8xf32>
    %155 = tpu.matmul %154, %151, %cst_53 {dimension_numbers = #tpu.dot_dimension_numbers<[1], [1], [0], [0], [0, 0, 1, 0], [], []>} : vector<32x16xf32>, vector<8x16xf32>, vector<32x8xf32> -> vector<32x8xf32>
    %cst_54 = arith.constant dense<0xFF800000> : vector<32xf32>
    %156 = vector.multi_reduction <maximumf>, %155, %cst_54 [1] : vector<32x8xf32> to vector<32xf32>
    %157 = vector.shape_cast %156 : vector<32xf32> to vector<32x1xf32>
    %158 = vector.broadcast %157 : vector<32x1xf32> to vector<32x8xf32>
    %159 = arith.subf %155, %158 : vector<32x8xf32>
    %160 = math.exp %159 : vector<32x8xf32>
    %cst_55 = arith.constant dense<0.000000e+00> : vector<32xf32>
    %161 = vector.multi_reduction <add>, %160, %cst_55 [1] : vector<32x8xf32> to vector<32xf32>
    %162 = vector.shape_cast %161 : vector<32xf32> to vector<32x1xf32>
    %163 = tpu.reciprocal %162 {approx = true} : vector<32x1xf32> -> vector<32x1xf32>
    %164 = vector.broadcast %163 : vector<32x1xf32> to vector<32x8xf32>
    %165 = arith.mulf %160, %164 : vector<32x8xf32>
    %cst_56 = arith.constant dense<0.000000e+00> : vector<32x16xf32>
    %166 = tpu.matmul %165, %152, %cst_56 {dimension_numbers = #tpu.dot_dimension_numbers<[1], [0], [0], [1], [0, 0, 1, 1], [], []>} : vector<32x8xf32>, vector<8x16xf32>, vector<32x16xf32> -> vector<32x16xf32>
    %167 = arith.mulf %166, %3 : vector<32x16xf32>
    %168 = vector.extract_strided_slice %167 {offsets = [0, 0], sizes = [8, 16], strides = [1, 1]} : vector<32x16xf32> to vector<8x16xf32>
    %169 = vector.extract_strided_slice %167 {offsets = [8, 0], sizes = [8, 16], strides = [1, 1]} : vector<32x16xf32> to vector<8x16xf32>
    %170 = arith.addf %168, %169 : vector<8x16xf32>
    %171 = vector.extract_strided_slice %167 {offsets = [16, 0], sizes = [8, 16], strides = [1, 1]} : vector<32x16xf32> to vector<8x16xf32>
    %172 = arith.addf %170, %171 : vector<8x16xf32>
    %173 = vector.extract_strided_slice %167 {offsets = [24, 0], sizes = [8, 16], strides = [1, 1]} : vector<32x16xf32> to vector<8x16xf32>
    %174 = arith.addf %172, %173 : vector<8x16xf32>
    %175 = vector.extract_strided_slice %141 {offsets = [0, 48], sizes = [16, 16], strides = [1, 1]} : vector<16x64xf32> to vector<16x16xf32>
    %cst_57 = arith.constant dense<0.000000e+00> : vector<8x16xf32>
    %176 = tpu.matmul %174, %175, %cst_57 {dimension_numbers = #tpu.dot_dimension_numbers<[1], [0], [0], [1], [0, 0, 1, 1], [], []>} : vector<8x16xf32>, vector<16x16xf32>, vector<8x16xf32> -> vector<8x16xf32>
    %177 = vector.extract_strided_slice %143 {offsets = [0, 48], sizes = [1, 16], strides = [1, 1]} : vector<1x64xf32> to vector<1x16xf32>
    %178 = vector.broadcast %177 : vector<1x16xf32> to vector<8x16xf32>
    %179 = arith.addf %176, %178 : vector<8x16xf32>
    %180 = tpu.concatenate %18, %99, %179, %19 in 1 : vector<8x16xf32>, vector<8x16xf32>, vector<8x16xf32>, vector<8x16xf32> -> vector<8x64xf32>
    %cst_58 = arith.constant dense<0.000000e+00> : vector<8x32xf32>
    %181 = tpu.matmul %180, %1, %cst_58 {dimension_numbers = #tpu.dot_dimension_numbers<[1], [0], [0], [1], [0, 0, 1, 1], [], []>} : vector<8x64xf32>, vector<64x32xf32>, vector<8x32xf32> -> vector<8x32xf32>
    %182 = vector.broadcast %6 : vector<1x32xf32> to vector<8x32xf32>
    %183 = arith.addf %181, %182 : vector<8x32xf32>
    %cst_59 = arith.constant 0.000000e+00 : f32
    %184 = vector.broadcast %cst_59 : f32 to vector<8x32xf32>
    %185 = arith.maximumf %183, %184 : vector<8x32xf32>
    %cst_60 = arith.constant dense<0.000000e+00> : vector<8x32xf32>
    %186 = tpu.matmul %185, %2, %cst_60 {dimension_numbers = #tpu.dot_dimension_numbers<[1], [0], [0], [1], [0, 0, 1, 1], [], []>} : vector<8x32xf32>, vector<32x32xf32>, vector<8x32xf32> -> vector<8x32xf32>
    %187 = vector.broadcast %7 : vector<1x32xf32> to vector<8x32xf32>
    %188 = arith.addf %186, %187 : vector<8x32xf32>
    %189 = vector.extract_strided_slice %188 {offsets = [0, 0], sizes = [8, 1], strides = [1, 1]} : vector<8x32xf32> to vector<8x1xf32>
    %c0_61 = arith.constant 0 : index
    %c0_62 = arith.constant 0 : index
    %c0_63 = arith.constant 0 : index
    %190 = vector.load %arg7[%c0_61, %c0_62, %c0_63] : memref<1x8x1xf32, #tpu.memory_space<vmem>>, vector<1x8x1xf32>
    %191 = vector.shape_cast %190 : vector<1x8x1xf32> to vector<8x1xf32>
    %192 = vector.shape_cast %189 : vector<8x1xf32> to vector<1x8x1xf32>
    tpu.vector_store %arg7[%c0_61, %c0_62, %c0_63], %192 {strides = array<i32>} : memref<1x8x1xf32, #tpu.memory_space<vmem>>, vector<1x8x1xf32>,
    return
  }
  func.func @transform_0(%arg0: i32) -> (i32, i32, i32) {
    %c0_i32 = arith.constant 0 : i32
    %c0_i32_0 = arith.constant 0 : i32
    %c0_i32_1 = arith.constant 0 : i32
    return %arg0, %c0_i32, %c0_i32_0 : i32, i32, i32
  }
  func.func @transform_1(%arg0: i32) -> (i32, i32, i32) {
    %c0_i32 = arith.constant 0 : i32
    %c0_i32_0 = arith.constant 0 : i32
    %c0_i32_1 = arith.constant 0 : i32
    return %arg0, %c0_i32, %c0_i32_0 : i32, i32, i32
  }
  func.func @transform_2(%arg0: i32) -> (i32, i32) {
    %c0_i32 = arith.constant 0 : i32
    %c0_i32_0 = arith.constant 0 : i32
    %c0_i32_1 = arith.constant 0 : i32
    return %c0_i32, %c0_i32_0 : i32, i32
  }
  func.func @transform_3(%arg0: i32) -> (i32, i32) {
    %c0_i32 = arith.constant 0 : i32
    %c0_i32_0 = arith.constant 0 : i32
    %c0_i32_1 = arith.constant 0 : i32
    return %c0_i32, %c0_i32_0 : i32, i32
  }
  func.func @transform_4(%arg0: i32) -> (i32, i32, i32) {
    %c0_i32 = arith.constant 0 : i32
    %c0_i32_0 = arith.constant 0 : i32
    %c0_i32_1 = arith.constant 0 : i32
    %c0_i32_2 = arith.constant 0 : i32
    return %c0_i32, %c0_i32_0, %c0_i32_1 : i32, i32, i32
  }
  func.func @transform_5(%arg0: i32) -> (i32, i32, i32) {
    %c0_i32 = arith.constant 0 : i32
    %c0_i32_0 = arith.constant 0 : i32
    %c0_i32_1 = arith.constant 0 : i32
    %c0_i32_2 = arith.constant 0 : i32
    return %c0_i32, %c0_i32_0, %c0_i32_1 : i32, i32, i32
  }
  func.func @transform_6(%arg0: i32) -> (i32, i32, i32) {
    %c0_i32 = arith.constant 0 : i32
    %c0_i32_0 = arith.constant 0 : i32
    %c0_i32_1 = arith.constant 0 : i32
    return %arg0, %c0_i32, %c0_i32_0 : i32, i32, i32
  }
}

</mosaic_0001>

<bundles_post_ra>
// kernel: matini_net_forward.1
= control target key start
LH: loop header
LB: loop body
LE: loop exit
PB: predicated region body
PF: predicated region fallthrough
CT: control target
= control target key end

     0   :  { %s2878_s21 = smov 0   ;;  %s3255_s0 = inlined_call_operand.vmem [shape: f32[4,8,32], index: 0, kind: input, shape index: {}]   ;;  %s3256_s1 = inlined_call_operand.vmem [shape: f32[4,8,24], index: 1, kind: input, shape index: {}]   ;;  %s3257_s2 = inlined_call_operand.vmem [shape: f32[184,32], index: 2, kind: input, shape index: {}]   ;;  %s3258_s3 = inlined_call_operand.vmem [shape: f32[3,32], index: 3, kind: input, shape index: {}]   ;;  %s3259_s4 = inlined_call_operand.vmem [shape: f32[4,16,64], index: 4, kind: input, shape index: {}]   ;;  %s3260_s5 = inlined_call_operand.vmem [shape: f32[4,1,64], index: 5, kind: input, shape index: {}]   ;;  %s3261_s6 = inlined_call_operand.vmem [shape: f32[4,8,1], index: 6, kind: output, shape index: {}]  }
   0x1 LB: > { %s2340_s22 = sadd.s32 4294967295, %s2833_s21   ;;  %p2344_p0 = scmp.ge.s32.totalorder %s2833_s21, 1  ;;  %s2833_s21 = sphi %s2878_s21, %s16_s21  }
   0x2   : > { %p220_p1 = scmp.lt.s32.totalorder %s2833_s21, 5 }
   0x4   : > { %p221_p2 = pnand %p2344_p0, %p220_p1 }
   0x5   : > { %p252_p3 = scmp.lt.s32.totalorder (!%p221_p2), %s2340_s22, 3  ;;  %v264_v0 = vld [vmem:[%s3257_s2] sm:$0xff] (!%p221_p2)  ;;  %v265_v1 = vld [vmem:[%s3257_s2 + $0x8] sm:$0xff] (!%p221_p2)  ;;  %v266_v2 = vld [vmem:[%s3257_s2 + $0x10] sm:$0xff] (!%p221_p2)  ;;  %v2835_v3 = vmov (!%p221_p2), 0.0|0.0   ;;  %vm2836_vm0 = vmmov (!%p221_p2), 0   ;;  %v296_v20 = vlaneseq (!%p221_p2) }
   0x6   : > { %224 = sbr.rel (%p221_p2) target bundleno = 6440 (0x1928), region = 44  ;;  %2671 = vmatprep.subr.bf16.mxu0 (!%p221_p2), %v2835_v3  ;;  %v2672_v4 = vpack.c.bf16 (!%p221_p2), %v265_v1, %v264_v0  ;;  %v267_v5 = vld [vmem:[%s3257_s2 + $0x18] sm:$0xff] (!%p221_p2)  ;;  %v2837_v6 = vmov (!%p221_p2), 0.0   ;;  %v268_v8 = vld [vmem:[%s3257_s2 + $0x20] sm:$0xff] (!%p221_p2)  ;;  %v269_v9 = vld [vmem:[%s3257_s2 + $0x28] sm:$0xff] (!%p221_p2)  ;;  %s2838_s15 = smov (!%p221_p2), 32  }
   0x7   : > { %2518 = vmatprep.mubr.msk.f32.mxu0 (!%p221_p2), %vm2836_vm0, %v2837_v6  ;;  %v2675_v7 = vpack.c.bf16 (!%p221_p2), %v267_v5, %v266_v2  ;;  %v2678_v11 = vpack.c.bf16 (!%p221_p2), %v269_v9, %v268_v8  ;;  %v270_v12 = vld [vmem:[%s3257_s2 + $0x30] sm:$0xff] (!%p221_p2)  ;;  %vm294_vm1 = vcmask (!%p221_p2), 261120   ;;  %vm300_vm2 = vcmask (!%p221_p2), 457728   ;;  %v2931_v16 = vld [vmem:[%s3259_s4] sm:$0xff] (!%p221_p2)  ;;  %v2936_v17 = vld [vmem:[%s3259_s4 + $0x8] sm:$0xff] (!%p221_p2)  ;;  %s2839_s28 = smov (!%p221_p2), 112  }
   0x8   : > { %2673 = vmatpush3.bf16.msra.mxu0 (!%p221_p2), %v2672_v4  ;;  %v2742_v18 = vpack.i.bf16 (!%p221_p2), %v2936_v17, %v2931_v16  ;;  %v2680_v19 = vpack.c.bf16 (!%p221_p2), %v2936_v17, %v2931_v16  ;;  %v2942_v21 = vshrl.u32 (!%p221_p2), %v296_v20, 7  ;;  %v287_v23 = vld [vmem:[%s3258_s3] sm:$0x7] (!%p221_p2)  ;;  %vm387_vm3 = vcmask (!%p221_p2), 130048   ;;  %v2967_v34 = vld [vmem:[%s3257_s2 + $0x98] sm:$0xff] (!%p221_p2)  ;;  %v2982_v39 = vld [vmem:[%s3257_s2 + $0xa8] sm:$0xff] (!%p221_p2) }
   0x9   : > { %2674 = vmatprep.subr.bf16.mxu0 (!%p221_p2), %v2835_v3  ;;  %v2961_v30 = vld [vmem:[%s3260_s5] ss:$0 sm:$0xff] (!%p221_p2)  ;;  %v2990_v42 = vld [vmem:[%s3257_s2 + $0xb0] sm:$0xff] (!%p221_p2)  ;;  %vm573_vm4 = vcmask (!%p221_p2), 64512   ;;  %s2840_s17 = smov (!%p221_p2), 96   ;;  %s2841_s18 = smov (!%p221_p2), 80  }
   0xa   : > { %2681 = vmatprep.subr.bf16.mxu1 (!%p221_p2), %v2680_v19  ;;  %v298_v22 = vsub.s32 (!%p221_p2), 0, %v2942_v21  ;;  %v2976_v37 = vld [vmem:[%s3257_s2 + $0xa0] sm:$0xff] (!%p221_p2)  ;;  %s2842_s8 = smov (!%p221_p2), 16   ;;  %vm2115_vm5 = vcmask (!%p221_p2), 392192   ;;  %vm2121_vm6 = vcmask (!%p221_p2), 523264   ;;  %vm2273_vm7 = vcmask (!%p221_p2), 7168  }
   0xb   : > { %2683 = vmatpush3.bf16.msra.mxu1 (!%p221_p2), %v2680_v19 }
   0xc   : > { %2676 = vmatpush3.bf16.msra.mxu0 (!%p221_p2), %v2675_v7  ;;  %v299_v24 = vrot.slane (!%p221_p2), %v287_v23, %v298_v22 }
   0xd   : > { %s3263_s22 = smov (!%p252_p3, %s2340_s22), 3  ;;  %2677 = vmatprep.subr.bf16.mxu0 %v2835_v3 }
   0xe   : > { %s2901_s7 = sshll.u32 %s3263_s22, 3 }
   0xf   : > { %s259_s14 = scalar_lea.vmem %s3256_s1, %s2901_s7  ;;  %s255_s20 = scalar_lea.vmem %s3255_s0, %s2901_s7 }
  0x10   : > { %v289_v10 = vld [vmem:[%s259_s14] sm:$0xff]  ;;  %2679 = vmatpush3.bf16.msra.mxu0 %v2678_v11  ;;  %s263_s24 = scalar_lea.vmem %s3261_s6, %s2901_s7 }
  0x11   : > { %291 = vrot.lane.b32.xlu0 %v289_v10, %s2838_s15  ;;  %2516 = vmatprep.subr.mxu0 %v2837_v6  ;;  %v288_v13 = vld [vmem:[%s255_s20] sm:$0xff] }
  0x14   : > { %2517 = vmatpush3.msra.mxu0 %v270_v12 }
  0x15   : > { %2684 = vmatprep.subr.bf16.mxu0 %v2835_v3 }
  0x83   : > { %v292_v14 = vpop.permute.xlu0 %291 }
  0x84   : > { %v295_v15 = vsel %vm294_vm1, %v288_v13, %v292_v14 }
  0x85   : > { %2519 = vmatmul.mubr.msk.f32.vlgmr.msra.gmra.mrb[0].mxu0 %vm300_vm2, %v295_v15 }
  0x86   : > { %2548 = vmatprep.mubr.msk.f32.mxu0 %vm2836_vm0, %v2837_v6 }
 0x158   : > { %v370_v25 = vpop.f32.mrb[0].mxu0 }
 0x159   : > { %v371_v26 = vadd.f32 %v370_v25, %v299_v24  ;;  %v2520_v27 = vpop.f32.mrb[1].mxu0 }
 0x15b   : > { %v2948_v28 = vmax.f32 %v371_v26, 0.0 }
 0x15d   : > { %379 = vrot.lane.b32.xlu0 %v2948_v28, %s2839_s28  ;;  %2525 = vmatprep.mubr.msk.f32.mxu1 %vm387_vm3, %v2948_v28 }
 0x1cf   : > { %v2954_v29 = vpop.permute.xlu0 %379 }
 0x1d0   : > { %2526 = vmatmul.mubr.msk.f32.vlgmr.msra.gmra.mrb[0].mxu1 %vm387_vm3, %v2954_v29 }
 0x2a3   : > { %v2527_v31 = vpop.f32.mrb[0].mxu1 }
 0x2a4   : > { %v464_v32 = vadd.f32 %v2527_v31, %v2961_v30  ;;  %v458_v33 = vpop.f32.mrb[1].mxu1 }
 0x2a5   : > { %v459_v35 = vadd.f32 %v2961_v30, %v458_v33 }
 0x2a6   : > { %472 = vrot.lane.b32.xlu1 %v464_v32, %s2839_s28 }
 0x2a7   : > { %v467_v36 = vmul.f32 %v459_v35, %v2967_v34  ;;  %v468_v40 = vmul.f32 %v459_v35, %v2976_v37  ;;  %v469_v41 = vmul.f32 %v459_v35, %v2982_v39  ;;  %v470_v43 = vmul.f32 %v459_v35, %v2990_v42 }
 0x2a9   : > { %2530 = vmatprep.mubr.msk.f32.mxu1 %vm387_vm3, %v467_v36 }
 0x318   : > { %v473_v38 = vpop.permute.xlu1 %472 }
 0x319   : > { %2528 = vmatprep.subr.msk.mxu1 %vm387_vm3, %v473_v38 }
 0x31a   : > { %2529 = vmatpush3.xpose.msk.msra.mxu1 %vm387_vm3, %v473_v38 }
 0x31d   : > { %2531 = vmatmul.mubr.msk.f32.vlgmr.msra.gmra.mrb[2].mxu1 %vm387_vm3, %v468_v40 }
 0x31e   : > { %2533 = vmatprep.mubr.msk.f32.mxu1 %vm387_vm3, %v469_v41 }
 0x321   : > { %2534 = vmatmul.mubr.msk.f32.gmra.mrb[4].mxu1 %vm387_vm3, %v470_v43 }
 0x3f0   : > { %v2532_v44 = vpop.f32.mrb[2].mxu1 }
 0x3f1   : > { %v554_v45 = vpop.f32.mrb[3].mxu1  ;;  %v577_v46 = vsel %vm573_vm4, %v2532_v44, -inf }
 0x3f2   : > { %578 = vmax.xlane.f32.xlu0 %v577_v46  ;;  %v574_v47 = vsel %vm573_vm4, %v554_v45, -inf  ;;  %v3028_v46 = vld [vmem:[%s3259_s4 + $0x18] sm:$0xff] }
 0x3f3   : > { %575 = vmax.xlane.f32.xlu1 %v574_v47 }
 0x3f4   : > { %v2535_v48 = vpop.f32.mrb[4].mxu1 }
 0x3f5   : > { %v564_v49 = vpop.f32.mrb[5].mxu1  ;;  %v583_v50 = vsel %vm573_vm4, %v2535_v48, -inf }
 0x3f6   : > { %v580_v51 = vsel %vm573_vm4, %v564_v49, -inf }
 0x3f7   : > { %584 = vmax.xlane.f32.xlu1 %v583_v50  ;;  %581 = vmax.xlane.f32.xlu0 %v580_v51 }
 0x47f   : > { %v579_v52 = vpop.xlane.xlu0 %578 }
 0x480   : > { %v587_v53 = vsub.f32 %v2532_v44, %v579_v52  ;;  %v576_v54 = vpop.xlane.xlu1 %575  ;;  %v2365_v52 = vld [vmem:[%s3260_s5 + $0x1] ss:$0 sm:$0xff] }
 0x481   : > { %v586_v55 = vsub.f32 %v554_v45, %v576_v54  ;;  %v3023_v45 = vld [vmem:[%s3259_s4 + $0x10] sm:$0xff] }
 0x482   : > { %v592_v56 = vmul.f32 1.442695, %v587_v53  ;;  %v2687_v47 = vpack.c.bf16 %v3028_v46, %v3023_v45 }
 0x483   : > { %v590_v57 = vmul.f32 1.442695, %v586_v55 }
 0x484   : > { %2762 = vpow2.f32 %v592_v56  ;;  %v585_v58 = vpop.xlane.xlu1 %584  ;;  %v582_v59 = vpop.xlane.xlu0 %581 }
 0x485   : > { %2764 = vpow2.f32 %v590_v57  ;;  %v589_v60 = vsub.f32 %v2535_v48, %v585_v58  ;;  %v588_v61 = vsub.f32 %v564_v49, %v582_v59 }
 0x487   : > { %v596_v62 = vmul.f32 1.442695, %v589_v60  ;;  %v594_v63 = vmul.f32 1.442695, %v588_v61 }
 0x489   : > { %2766 = vpow2.f32 %v596_v62 }
 0x48a   : > { %2768 = vpow2.f32 %v594_v63 }
 0x48e   : > { %v2763_v0 = vpop.eup %2762 }
 0x48f   : > { %v2765_v1 = vpop.eup %2764  ;;  %v601_v2 = vsel %vm573_vm4, %v2763_v0, 0.0 }
 0x490   : > { %602 = vadd.xlane.f32.xlu1 %v601_v2  ;;  %v598_v4 = vsel %vm573_vm4, %v2765_v1, 0.0 }
 0x491   : > { %599 = vadd.xlane.f32.xlu0 %v598_v4 }
 0x493   : > { %v2767_v5 = vpop.eup %2766 }
 0x494   : > { %v2769_v7 = vpop.eup %2768  ;;  %v607_v8 = vsel %vm573_vm4, %v2767_v5, 0.0 }
 0x495   : > { %608 = vadd.xlane.f32.xlu1 %v607_v8  ;;  %v604_v9 = vsel %vm573_vm4, %v2769_v7, 0.0 }
 0x496   : > { %605 = vadd.xlane.f32.xlu0 %v604_v9 }
 0x4a6   : > { %2743 = vrot.lane.b32.xlu1 %v2742_v18, %s2841_s18 }
 0x4aa   : > { %733 = vrot.lane.b32.xlu1 %v2961_v30, %s2841_s18 }
 0x4ac   : > { %618 = vrot.lane.b32.xlu0 %v464_v32, %s2840_s17 }
 0x51d   : > { %v603_v10 = vpop.xlane.xlu1 %602 }
 0x51e   : > { %2770 = vrcp.f32 %v603_v10  ;;  %v600_v11 = vpop.xlane.xlu0 %599 }
 0x51f   : > { %2772 = vrcp.f32 %v600_v11 }
 0x522   : > { %v609_v12 = vpop.xlane.xlu1 %608 }
 0x523   : > { %2774 = vrcp.f32 %v609_v12  ;;  %v606_v13 = vpop.xlane.xlu0 %605 }
 0x524   : > { %2776 = vrcp.f32 %v606_v13 }
 0x526   : > { %v2744_v24 = vpop.permute.xlu1 %2743 }
 0x527   : > { %v619_v14 = vpop.permute.xlu0 %618  ;;  %v2746_v25 = vunpack.i.h.bf16 %v2744_v24  ;;  %v2745_v26 = vunpack.i.l.bf16 %v2744_v24 }
 0x528   : > { %v2771_v15 = vpop.eup %2770  ;;  %2536 = vmatprep.subr.mxu1 %v619_v14 }
 0x529   : > { %v2773_v19 = vpop.eup %2772  ;;  %2537 = vmatpush3.msra.mxu1 %v619_v14  ;;  %v615_v22 = vmul.f32 %v2771_v15, %v2763_v0  ;;  %v2685_v27 = vpack.c.bf16 %v2746_v25, %v2745_v26 }
 0x52a   : > { %v614_v20 = vmul.f32 %v2773_v19, %v2765_v1  ;;  %v734_v48 = vpop.permute.xlu1 %733 }
 0x52b   : > { %2686 = vmatpush3.bf16.msra.mxu0 %v2685_v27 }
 0x52c   : > { %2538 = vmatprep.mubr.msk.f32.mxu1 %vm573_vm4, %v614_v20  ;;  %2688 = vmatprep.subr.bf16.mxu0 %v2687_v47 }
 0x52d   : > { %v2775_v16 = vpop.eup %2774  ;;  %2539 = vmatmul.mubr.msk.f32.vlgmr.msra.gmra.mrb[6].mxu1 %vm573_vm4, %v615_v22 }
 0x52e   : > { %v2777_v17 = vpop.eup %2776  ;;  %v617_v18 = vmul.f32 %v2775_v16, %v2767_v5 }
 0x52f   : > { %v616_v23 = vmul.f32 %v2777_v17, %v2769_v7 }
 0x531   : > { %2541 = vmatprep.mubr.msk.f32.mxu1 %vm573_vm4, %v616_v23 }
 0x532   : > { %2542 = vmatmul.mubr.msk.f32.gmra.mrb[8].mxu1 %vm573_vm4, %v617_v18 }
 0x600   : > { %v2540_v30 = vpop.f32.mrb[6].mxu1 }
 0x601   : > { %v719_v31 = vmul.f32 %v2540_v30, %v2976_v37  ;;  %v699_v32 = vpop.f32.mrb[7].mxu1 }
 0x602   : > { %v718_v33 = vmul.f32 %v699_v32, %v2967_v34 }
 0x604   : > { %v722_v35 = vadd.f32 %v719_v31, %v718_v33  ;;  %v2747_v31 = vpack.i.bf16 %v3028_v46, %v3023_v45 }
 0x605   : > { %v2543_v36 = vpop.f32.mrb[8].mxu1 }
 0x606   : > { %v709_v38 = vpop.f32.mrb[9].mxu1  ;;  %v721_v41 = vmul.f32 %v2543_v36, %v2990_v42 }
 0x607   : > { %v720_v40 = vmul.f32 %v709_v38, %v2982_v39 }
 0x609   : > { %v723_v43 = vadd.f32 %v722_v35, %v720_v40 }
 0x60b   : > { %v724_v44 = vadd.f32 %v723_v43, %v721_v41 }
 0x60d   : > { %2549 = vmatmul.mubr.msk.f32.vlgmr.msra.gmra.mrb[2].mxu0 %vm387_vm3, %v724_v44 }
 0x60e   : > { %2690 = vmatpush3.bf16.msra.mxu0 %v2687_v47 }
 0x6e0   : > { %v805_v49 = vpop.f32.mrb[2].mxu0 }
 0x6e1   : > { %v806_v50 = vadd.f32 %v805_v49, %v734_v48  ;;  %v2550_v51 = vpop.f32.mrb[3].mxu0 }
 0x6e3   : > { %2555 = vmatprep.mubr.msk.f32.mxu0 %vm387_vm3, %v806_v50 }
 0x6e4   : > { %2556 = vmatmul.mubr.msk.f32.vlgmr.msra.gmra.mrb[4].mxu0 %vm387_vm3, %v2954_v29 }
 0x7b7   : > { %v2557_v53 = vpop.f32.mrb[4].mxu0 }
 0x7b8   : > { %v895_v54 = vadd.f32 %v2557_v53, %v2365_v52  ;;  %v889_v55 = vpop.f32.mrb[5].mxu0 }
 0x7b9   : > { %v890_v56 = vadd.f32 %v2365_v52, %v889_v55 }
 0x7ba   : > { %903 = vrot.lane.b32.xlu0 %v895_v54, %s2839_s28 }
 0x7bb   : > { %v898_v57 = vmul.f32 %v890_v56, %v2967_v34  ;;  %v899_v59 = vmul.f32 %v890_v56, %v2976_v37  ;;  %v900_v60 = vmul.f32 %v890_v56, %v2982_v39  ;;  %v901_v61 = vmul.f32 %v890_v56, %v2990_v42 }
 0x7bd   : > { %2560 = vmatprep.mubr.msk.f32.mxu1 %vm387_vm3, %v898_v57 }
 0x82c   : > { %v904_v58 = vpop.permute.xlu0 %903 }
 0x82d   : > { %2558 = vmatprep.subr.msk.mxu1 %vm387_vm3, %v904_v58 }
 0x82e   : > { %2559 = vmatpush3.xpose.msk.msra.mxu1 %vm387_vm3, %v904_v58 }
 0x82f   : > { %2691 = vmatprep.subr.bf16.mxu1 %v2835_v3 }
 0x831   : > { %2561 = vmatmul.mubr.msk.f32.vlgmr.msra.gmra.mrb[10].mxu1 %vm387_vm3, %v899_v59 }
 0x832   : > { %2563 = vmatprep.mubr.msk.f32.mxu1 %vm387_vm3, %v900_v60 }
 0x835   : > { %2564 = vmatmul.mubr.msk.f32.gmra.mrb[12].mxu1 %vm387_vm3, %v901_v61 }
 0x836   : > { %2578 = vmatprep.mubr.msk.f32.mxu1 %vm2836_vm0, %v2837_v6 }
 0x904   : > { %v2562_v62 = vpop.f32.mrb[10].mxu1 }
 0x905   : > { %v985_v63 = vpop.f32.mrb[11].mxu1  ;;  %v1007_v0 = vsel %vm573_vm4, %v2562_v62, -inf }
 0x906   : > { %1008 = vmax.xlane.f32.xlu0 %v1007_v0  ;;  %v1004_v1 = vsel %vm573_vm4, %v985_v63, -inf  ;;  %v3084_v0 = vld [vmem:[%s3259_s4 + $0x28] sm:$0xff] }
 0x907   : > { %1005 = vmax.xlane.f32.xlu1 %v1004_v1 }
 0x908   : > { %v2565_v2 = vpop.f32.mrb[12].mxu1 }
 0x909   : > { %v995_v4 = vpop.f32.mrb[13].mxu1  ;;  %v1013_v5 = vsel %vm573_vm4, %v2565_v2, -inf }
 0x90a   : > { %v1010_v7 = vsel %vm573_vm4, %v995_v4, -inf }
 0x90b   : > { %1014 = vmax.xlane.f32.xlu1 %v1013_v5  ;;  %1011 = vmax.xlane.f32.xlu0 %v1010_v7 }
 0x993   : > { %v1009_v8 = vpop.xlane.xlu0 %1008 }
 0x994   : > { %v1017_v9 = vsub.f32 %v2562_v62, %v1009_v8  ;;  %v1006_v10 = vpop.xlane.xlu1 %1005 }
 0x995   : > { %v1016_v11 = vsub.f32 %v985_v63, %v1006_v10  ;;  %v3079_v63 = vld [vmem:[%s3259_s4 + $0x20] sm:$0xff] }
 0x996   : > { %v1022_v12 = vmul.f32 1.442695, %v1017_v9  ;;  %v2694_v1 = vpack.c.bf16 %v3084_v0, %v3079_v63  ;;  %v2381_v10 = vld [vmem:[%s3260_s5 + $0x2] ss:$0 sm:$0xff] }
 0x997   : > { %v1020_v13 = vmul.f32 1.442695, %v1016_v11 }
 0x998   : > { %2778 = vpow2.f32 %v1022_v12  ;;  %v1015_v14 = vpop.xlane.xlu1 %1014  ;;  %v1012_v15 = vpop.xlane.xlu0 %1011 }
 0x999   : > { %2780 = vpow2.f32 %v1020_v13  ;;  %v1019_v19 = vsub.f32 %v2565_v2, %v1015_v14  ;;  %v1018_v20 = vsub.f32 %v995_v4, %v1012_v15 }
 0x99b   : > { %v1026_v22 = vmul.f32 1.442695, %v1019_v19  ;;  %v1024_v16 = vmul.f32 1.442695, %v1018_v20 }
 0x99d   : > { %2782 = vpow2.f32 %v1026_v22 }
 0x99e   : > { %2784 = vpow2.f32 %v1024_v16 }
 0x9a2   : > { %v2779_v17 = vpop.eup %2778 }
 0x9a3   : > { %v2781_v18 = vpop.eup %2780  ;;  %v1031_v23 = vsel %vm573_vm4, %v2779_v17, 0.0 }
 0x9a4   : > { %1032 = vadd.xlane.f32.xlu1 %v1031_v23  ;;  %v1028_v24 = vsel %vm573_vm4, %v2781_v18, 0.0 }
 0x9a5   : > { %1029 = vadd.xlane.f32.xlu0 %v1028_v24 }
 0x9a7   : > { %v2783_v25 = vpop.eup %2782 }
 0x9a8   : > { %v2785_v26 = vpop.eup %2784  ;;  %v1037_v27 = vsel %vm573_vm4, %v2783_v25, 0.0 }
 0x9a9   : > { %1038 = vadd.xlane.f32.xlu1 %v1037_v27  ;;  %v1034_v30 = vsel %vm573_vm4, %v2785_v26, 0.0 }
 0x9aa   : > { %1035 = vadd.xlane.f32.xlu0 %v1034_v30 }
 0x9ba   : > { %2748 = vrot.lane.b32.xlu1 %v2747_v31, %s2841_s18 }
 0x9be   : > { %1163 = vrot.lane.b32.xlu1 %v2365_v52, %s2841_s18 }
 0x9c0   : > { %1048 = vrot.lane.b32.xlu0 %v895_v54, %s2840_s17 }
 0xa31   : > { %v1033_v32 = vpop.xlane.xlu1 %1032 }
 0xa32   : > { %2786 = vrcp.f32 %v1033_v32  ;;  %v1030_v33 = vpop.xlane.xlu0 %1029 }
 0xa33   : > { %2788 = vrcp.f32 %v1030_v33 }
 0xa36   : > { %v1039_v35 = vpop.xlane.xlu1 %1038 }
 0xa37   : > { %2790 = vrcp.f32 %v1039_v35  ;;  %v1036_v36 = vpop.xlane.xlu0 %1035 }
 0xa38   : > { %2792 = vrcp.f32 %v1036_v36 }
 0xa3a   : > { %v2749_v49 = vpop.permute.xlu1 %2748 }
 0xa3b   : > { %v1049_v38 = vpop.permute.xlu0 %1048  ;;  %v2751_v50 = vunpack.i.h.bf16 %v2749_v49  ;;  %v2750_v51 = vunpack.i.l.bf16 %v2749_v49 }
 0xa3c   : > { %v2787_v40 = vpop.eup %2786  ;;  %2566 = vmatprep.subr.mxu0 %v1049_v38 }
 0xa3d   : > { %v2789_v41 = vpop.eup %2788  ;;  %2567 = vmatpush3.msra.mxu0 %v1049_v38  ;;  %v1045_v44 = vmul.f32 %v2787_v40, %v2779_v17  ;;  %v2692_v52 = vpack.c.bf16 %v2751_v50, %v2750_v51 }
 0xa3e   : > { %v1044_v43 = vmul.f32 %v2789_v41, %v2781_v18  ;;  %2695 = vmatprep.subr.bf16.mxu0 %v2694_v1  ;;  %v1164_v2 = vpop.permute.xlu1 %1163 }
 0xa3f   : > { %2693 = vmatpush3.bf16.msra.mxu1 %v2692_v52 }
 0xa40   : > { %2568 = vmatprep.mubr.msk.f32.mxu0 %vm573_vm4, %v1044_v43 }
 0xa41   : > { %v2791_v45 = vpop.eup %2790  ;;  %2569 = vmatmul.mubr.msk.f32.vlgmr.msra.gmra.mrb[6].mxu0 %vm573_vm4, %v1045_v44 }
 0xa42   : > { %v2793_v46 = vpop.eup %2792  ;;  %v1047_v47 = vmul.f32 %v2791_v45, %v2783_v25  ;;  %2697 = vmatpush3.bf16.msra.mxu0 %v2694_v1 }
 0xa43   : > { %v1046_v48 = vmul.f32 %v2793_v46, %v2785_v26 }
 0xa45   : > { %2571 = vmatprep.mubr.msk.f32.mxu0 %vm573_vm4, %v1046_v48 }
 0xa46   : > { %2572 = vmatmul.mubr.msk.f32.gmra.mrb[8].mxu0 %vm573_vm4, %v1047_v47 }
 0xa47   : > { %2585 = vmatprep.mubr.msk.f32.mxu0 %vm387_vm3, %v2954_v29 }
 0xb14   : > { %v2570_v53 = vpop.f32.mrb[6].mxu0 }
 0xb15   : > { %v1149_v54 = vmul.f32 %v2570_v53, %v2976_v37  ;;  %v1129_v55 = vpop.f32.mrb[7].mxu0 }
 0xb16   : > { %v1148_v56 = vmul.f32 %v1129_v55, %v2967_v34  ;;  %v2752_v55 = vpack.i.bf16 %v3084_v0, %v3079_v63 }
 0xb18   : > { %v1152_v57 = vadd.f32 %v1149_v54, %v1148_v56 }
 0xb19   : > { %v2573_v58 = vpop.f32.mrb[8].mxu0 }
 0xb1a   : > { %v1139_v59 = vpop.f32.mrb[9].mxu0  ;;  %v1151_v61 = vmul.f32 %v2573_v58, %v2990_v42 }
 0xb1b   : > { %v1150_v60 = vmul.f32 %v1139_v59, %v2982_v39 }
 0xb1d   : > { %v1153_v62 = vadd.f32 %v1152_v57, %v1150_v60 }
 0xb1f   : > { %v1154_v29 = vadd.f32 %v1153_v62, %v1151_v61 }
 0xb21   : > { %2579 = vmatmul.mubr.msk.f32.vlgmr.msra.gmra.mrb[14].mxu1 %vm387_vm3, %v1154_v29 }
 0xbf4   : > { %v1235_v4 = vpop.f32.mrb[14].mxu1 }
 0xbf5   : > { %v3088_v5 = vadd.f32 %v1235_v4, %v1164_v2  ;;  %v2580_v7 = vpop.f32.mrb[15].mxu1 }
 0xbf7   : > { %1245 = vrot.lane.b32.xlu0 %v3088_v5, %s2842_s8 }
 0xc69   : > { %v3091_v8 = vpop.permute.xlu0 %1245 }
 0xc6a   : > { %1253 = vrot.lane.b32.xlu1 %v3091_v8, %s2839_s28 }
 0xcdc   : > { %v1254_v9 = vpop.permute.xlu1 %1253 }
 0xcdd   : > { %2586 = vmatmul.mubr.msk.f32.vlgmr.msra.gmra.mrb[10].mxu0 %vm387_vm3, %v1254_v9 }
 0xdb0   : > { %v2587_v11 = vpop.f32.mrb[10].mxu0 }
 0xdb1   : > { %v1329_v12 = vadd.f32 %v2587_v11, %v2381_v10  ;;  %v1323_v13 = vpop.f32.mrb[11].mxu0 }
 0xdb2   : > { %v1324_v14 = vadd.f32 %v2381_v10, %v1323_v13 }
 0xdb3   : > { %1337 = vrot.lane.b32.xlu0 %v1329_v12, %s2839_s28 }
 0xdb4   : > { %v1332_v15 = vmul.f32 %v1324_v14, %v2967_v34  ;;  %v1333_v20 = vmul.f32 %v1324_v14, %v2976_v37  ;;  %v1334_v22 = vmul.f32 %v1324_v14, %v2982_v39  ;;  %v1335_v16 = vmul.f32 %v1324_v14, %v2990_v42 }
 0xdb6   : > { %2590 = vmatprep.mubr.msk.f32.mxu1 %vm387_vm3, %v1332_v15 }
 0xe25   : > { %v1338_v19 = vpop.permute.xlu0 %1337 }
 0xe26   : > { %2588 = vmatprep.subr.msk.mxu1 %vm387_vm3, %v1338_v19 }
 0xe27   : > { %2589 = vmatpush3.xpose.msk.msra.mxu1 %vm387_vm3, %v1338_v19 }
 0xe28   : > { %2698 = vmatprep.subr.bf16.mxu1 %v2835_v3 }
 0xe2a   : > { %2591 = vmatmul.mubr.msk.f32.vlgmr.msra.gmra.mrb[16].mxu1 %vm387_vm3, %v1333_v20 }
 0xe2b   : > { %2593 = vmatprep.mubr.msk.f32.mxu1 %vm387_vm3, %v1334_v22 }
 0xe2e   : > { %2594 = vmatmul.mubr.msk.f32.gmra.mrb[18].mxu1 %vm387_vm3, %v1335_v16 }
 0xe2f   : > { %2608 = vmatprep.mubr.msk.f32.mxu1 %vm2836_vm0, %v2837_v6 }
 0xefd   : > { %v2592_v17 = vpop.f32.mrb[16].mxu1 }
 0xefe   : > { %v1419_v18 = vpop.f32.mrb[17].mxu1  ;;  %v1441_v23 = vsel %vm573_vm4, %v2592_v17, -inf }
 0xeff   : > { %1442 = vmax.xlane.f32.xlu0 %v1441_v23  ;;  %v1438_v24 = vsel %vm573_vm4, %v1419_v18, -inf }
 0xf00   : > { %1439 = vmax.xlane.f32.xlu1 %v1438_v24  ;;  %v3138_v24 = vld [vmem:[%s3259_s4 + $0x30] sm:$0xff] }
 0xf01   : > { %v2595_v25 = vpop.f32.mrb[18].mxu1 }
 0xf02   : > { %v1429_v26 = vpop.f32.mrb[19].mxu1  ;;  %v1447_v27 = vsel %vm573_vm4, %v2595_v25, -inf }
 0xf03   : > { %v1444_v30 = vsel %vm573_vm4, %v1429_v26, -inf }
 0xf04   : > { %1448 = vmax.xlane.f32.xlu1 %v1447_v27  ;;  %1445 = vmax.xlane.f32.xlu0 %v1444_v30 }
 0xf8c   : > { %v1443_v31 = vpop.xlane.xlu0 %1442 }
 0xf8d   : > { %v1451_v32 = vsub.f32 %v2592_v17, %v1443_v31  ;;  %v1440_v33 = vpop.xlane.xlu1 %1439 }
 0xf8e   : > { %v1450_v35 = vsub.f32 %v1419_v18, %v1440_v33  ;;  %v2397_v33 = vld [vmem:[%s3260_s5 + $0x3] ss:$0 sm:$0xff] }
 0xf8f   : > { %v1456_v36 = vmul.f32 1.442695, %v1451_v32 }
 0xf90   : > { %v1454_v38 = vmul.f32 1.442695, %v1450_v35 }
 0xf91   : > { %2794 = vpow2.f32 %v1456_v36  ;;  %v1449_v40 = vpop.xlane.xlu1 %1448  ;;  %v1446_v41 = vpop.xlane.xlu0 %1445 }
 0xf92   : > { %2796 = vpow2.f32 %v1454_v38  ;;  %v1453_v43 = vsub.f32 %v2595_v25, %v1449_v40  ;;  %v1452_v44 = vsub.f32 %v1429_v26, %v1446_v41  ;;  %v3143_v25 = vld [vmem:[%s3259_s4 + $0x38] sm:$0xff] }
 0xf93   : > { %v2701_v26 = vpack.c.bf16 %v3143_v25, %v3138_v24 }
 0xf94   : > { %v1460_v45 = vmul.f32 1.442695, %v1453_v43  ;;  %v1458_v46 = vmul.f32 1.442695, %v1452_v44 }
 0xf96   : > { %2798 = vpow2.f32 %v1460_v45 }
 0xf97   : > { %2800 = vpow2.f32 %v1458_v46 }
 0xf9b   : > { %v2795_v47 = vpop.eup %2794 }
 0xf9c   : > { %v2797_v48 = vpop.eup %2796  ;;  %v1465_v49 = vsel %vm573_vm4, %v2795_v47, 0.0 }
 0xf9d   : > { %1466 = vadd.xlane.f32.xlu1 %v1465_v49  ;;  %v1462_v50 = vsel %vm573_vm4, %v2797_v48, 0.0 }
 0xf9e   : > { %1463 = vadd.xlane.f32.xlu0 %v1462_v50 }
 0xfa0   : > { %v2799_v51 = vpop.eup %2798 }
 0xfa1   : > { %v2801_v52 = vpop.eup %2800  ;;  %v1471_v53 = vsel %vm573_vm4, %v2799_v51, 0.0 }
 0xfa2   : > { %1472 = vadd.xlane.f32.xlu1 %v1471_v53  ;;  %v1468_v54 = vsel %vm573_vm4, %v2801_v52, 0.0 }
 0xfa3   : > { %1469 = vadd.xlane.f32.xlu0 %v1468_v54 }
 0xfb3   : > { %2753 = vrot.lane.b32.xlu1 %v2752_v55, %s2841_s18 }
 0xfb7   : > { %1597 = vrot.lane.b32.xlu1 %v2381_v10, %s2841_s18 }
 0xfb9   : > { %1482 = vrot.lane.b32.xlu0 %v1329_v12, %s2840_s17 }
0x102a   : > { %v1467_v56 = vpop.xlane.xlu1 %1466 }
0x102b   : > { %2802 = vrcp.f32 %v1467_v56  ;;  %v1464_v57 = vpop.xlane.xlu0 %1463 }
0x102c   : > { %2804 = vrcp.f32 %v1464_v57 }
0x102f   : > { %v1473_v58 = vpop.xlane.xlu1 %1472 }
0x1030   : > { %2806 = vrcp.f32 %v1473_v58  ;;  %v1470_v59 = vpop.xlane.xlu0 %1469 }
0x1031   : > { %2808 = vrcp.f32 %v1470_v59 }
0x1033   : > { %v2754_v7 = vpop.permute.xlu1 %2753 }
0x1034   : > { %v1483_v60 = vpop.permute.xlu0 %1482  ;;  %v2756_v9 = vunpack.i.h.bf16 %v2754_v7  ;;  %v2755_v10 = vunpack.i.l.bf16 %v2754_v7 }
0x1035   : > { %v2803_v61 = vpop.eup %2802  ;;  %2596 = vmatprep.subr.mxu0 %v1483_v60 }
0x1036   : > { %v2805_v62 = vpop.eup %2804  ;;  %2597 = vmatpush3.msra.mxu0 %v1483_v60  ;;  %v1479_v1 = vmul.f32 %v2803_v61, %v2795_v47  ;;  %v2699_v11 = vpack.c.bf16 %v2756_v9, %v2755_v10 }
0x1037   : > { %v1478_v29 = vmul.f32 %v2805_v62, %v2797_v48  ;;  %2702 = vmatprep.subr.bf16.mxu0 %v2701_v26  ;;  %v1598_v27 = vpop.permute.xlu1 %1597 }
0x1038   : > { %2700 = vmatpush3.bf16.msra.mxu1 %v2699_v11 }
0x1039   : > { %2598 = vmatprep.mubr.msk.f32.mxu0 %vm573_vm4, %v1478_v29 }
0x103a   : > { %v2807_v63 = vpop.eup %2806  ;;  %2599 = vmatmul.mubr.msk.f32.vlgmr.msra.gmra.mrb[12].mxu0 %vm573_vm4, %v1479_v1 }
0x103b   : > { %v2809_v0 = vpop.eup %2808  ;;  %v1481_v2 = vmul.f32 %v2807_v63, %v2799_v51  ;;  %2704 = vmatpush3.bf16.msra.mxu0 %v2701_v26 }
0x103c   : > { %v1480_v4 = vmul.f32 %v2809_v0, %v2801_v52 }
0x103e   : > { %2601 = vmatprep.mubr.msk.f32.mxu0 %vm573_vm4, %v1480_v4 }
0x103f   : > { %2602 = vmatmul.mubr.msk.f32.gmra.mrb[14].mxu0 %vm573_vm4, %v1481_v2 }
0x110d   : > { %v2600_v12 = vpop.f32.mrb[12].mxu0 }
0x110e   : > { %v1583_v13 = vmul.f32 %v2600_v12, %v2976_v37  ;;  %v1563_v14 = vpop.f32.mrb[13].mxu0 }
0x110f   : > { %v1582_v15 = vmul.f32 %v1563_v14, %v2967_v34 }
0x1111   : > { %v1586_v19 = vadd.f32 %v1583_v13, %v1582_v15  ;;  %v2757_v13 = vpack.i.bf16 %v3143_v25, %v3138_v24 }
0x1112   : > { %v2603_v20 = vpop.f32.mrb[14].mxu0 }
0x1113   : > { %v1573_v22 = vpop.f32.mrb[15].mxu0  ;;  %v1585_v17 = vmul.f32 %v2603_v20, %v2990_v42 }
0x1114   : > { %v1584_v16 = vmul.f32 %v1573_v22, %v2982_v39 }
0x1116   : > { %v1587_v18 = vadd.f32 %v1586_v19, %v1584_v16 }
0x1118   : > { %v1588_v23 = vadd.f32 %v1587_v18, %v1585_v17 }
0x111a   : > { %2609 = vmatmul.mubr.msk.f32.vlgmr.msra.gmra.mrb[20].mxu1 %vm387_vm3, %v1588_v23 }
0x11ed   : > { %v1669_v30 = vpop.f32.mrb[20].mxu1 }
0x11ee   : > { %v1670_v31 = vadd.f32 %v1669_v30, %v1598_v27  ;;  %v2610_v32 = vpop.f32.mrb[21].mxu1 }
0x11f0   : > { %2615 = vmatprep.mubr.msk.f32.mxu0 %vm387_vm3, %v1670_v31 }
0x11f1   : > { %2616 = vmatmul.mubr.msk.f32.vlgmr.msra.gmra.mrb[16].mxu0 %vm387_vm3, %v3088_v5 }
0x12c4   : > { %v2617_v35 = vpop.f32.mrb[16].mxu0 }
0x12c5   : > { %v1761_v36 = vadd.f32 %v2617_v35, %v2397_v33  ;;  %v1755_v38 = vpop.f32.mrb[17].mxu0 }
0x12c6   : > { %v1756_v40 = vadd.f32 %v2397_v33, %v1755_v38 }
0x12c7   : > { %1769 = vrot.lane.b32.xlu0 %v1761_v36, %s2839_s28 }
0x12c8   : > { %v1764_v41 = vmul.f32 %v1756_v40, %v2967_v34  ;;  %v1765_v5 = vmul.f32 %v1756_v40, %v2976_v37  ;;  %v1766_v44 = vmul.f32 %v1756_v40, %v2982_v39  ;;  %v1767_v45 = vmul.f32 %v1756_v40, %v2990_v42 }
0x12ca   : > { %2620 = vmatprep.mubr.msk.f32.mxu1 %vm387_vm3, %v1764_v41 }
0x1339   : > { %v1770_v43 = vpop.permute.xlu0 %1769 }
0x133a   : > { %2618 = vmatprep.subr.msk.mxu1 %vm387_vm3, %v1770_v43 }
0x133b   : > { %2619 = vmatpush3.xpose.msk.msra.mxu1 %vm387_vm3, %v1770_v43 }
0x133c   : > { %2705 = vmatprep.subr.bf16.mxu1 %v2835_v3 }
0x133e   : > { %2621 = vmatmul.mubr.msk.f32.vlgmr.msra.gmra.mrb[22].mxu1 %vm387_vm3, %v1765_v5 }
0x133f   : > { %2623 = vmatprep.mubr.msk.f32.mxu1 %vm387_vm3, %v1766_v44 }
0x1342   : > { %2624 = vmatmul.mubr.msk.f32.gmra.mrb[24].mxu1 %vm387_vm3, %v1767_v45 }
0x1343   : > { %2638 = vmatprep.mubr.msk.f32.mxu1 %vm2836_vm0, %v2837_v6 }
0x1411   : > { %v2622_v46 = vpop.f32.mrb[22].mxu1 }
0x1412   : > { %v1851_v47 = vpop.f32.mrb[23].mxu1  ;;  %v1873_v48 = vsel %vm573_vm4, %v2622_v46, -inf }
0x1413   : > { %1874 = vmax.xlane.f32.xlu0 %v1873_v48  ;;  %v1870_v49 = vsel %vm573_vm4, %v1851_v47, -inf  ;;  %v274_v48 = vld [vmem:[%s3257_s2 + $0x50] sm:$0xff] }
0x1414   : > { %1871 = vmax.xlane.f32.xlu1 %v1870_v49 }
0x1415   : > { %v2625_v50 = vpop.f32.mrb[24].mxu1 }
0x1416   : > { %v1861_v51 = vpop.f32.mrb[25].mxu1  ;;  %v1879_v52 = vsel %vm573_vm4, %v2625_v50, -inf }
0x1417   : > { %v1876_v53 = vsel %vm573_vm4, %v1861_v51, -inf }
0x1418   : > { %1880 = vmax.xlane.f32.xlu1 %v1879_v52  ;;  %1877 = vmax.xlane.f32.xlu0 %v1876_v53  ;;  %v277_v52 = vld [vmem:[%s3257_s2 + $0x68] sm:$0xff]  ;;  %v278_v53 = vld [vmem:[%s3257_s2 + $0x70] sm:$0xff] }
0x14a0   : > { %v1875_v54 = vpop.xlane.xlu0 %1874 }
0x14a1   : > { %v1883_v55 = vsub.f32 %v2622_v46, %v1875_v54  ;;  %v1872_v56 = vpop.xlane.xlu1 %1871  ;;  %v2718_v54 = vpack.c.bf16 %v278_v53, %v277_v52 }
0x14a2   : > { %v1882_v57 = vsub.f32 %v1851_v47, %v1872_v56  ;;  %v280_v56 = vld [vmem:[%s3257_s2 + $0x80] sm:$0xff] }
0x14a3   : > { %v1888_v58 = vmul.f32 1.442695, %v1883_v55  ;;  %v279_v55 = vld [vmem:[%s3257_s2 + $0x78] sm:$0xff] }
0x14a4   : > { %v1886_v59 = vmul.f32 1.442695, %v1882_v57  ;;  %v2721_v57 = vpack.c.bf16 %v280_v56, %v279_v55 }
0x14a5   : > { %2810 = vpow2.f32 %v1888_v58  ;;  %v1881_v60 = vpop.xlane.xlu1 %1880  ;;  %v1878_v61 = vpop.xlane.xlu0 %1877 }
0x14a6   : > { %2812 = vpow2.f32 %v1886_v59  ;;  %v1885_v62 = vsub.f32 %v2625_v50, %v1881_v60  ;;  %v1884_v29 = vsub.f32 %v1861_v51, %v1878_v61  ;;  %v276_v50 = vld [vmem:[%s3257_s2 + $0x60] sm:$0xff] }
0x14a8   : > { %v1892_v1 = vmul.f32 1.442695, %v1885_v62  ;;  %v1890_v63 = vmul.f32 1.442695, %v1884_v29  ;;  %v2113_v62 = vsel %vm387_vm3, %v2948_v28, %v3091_v8  ;;  %v2826_v8 = vld [vmem:[%s3258_s3] sm:$0x7] }
0x14aa   : > { %2814 = vpow2.f32 %v1892_v1 }
0x14ab   : > { %2816 = vpow2.f32 %v1890_v63 }
0x14af   : > { %v2811_v0 = vpop.eup %2810 }
0x14b0   : > { %v2813_v2 = vpop.eup %2812  ;;  %v1897_v4 = vsel %vm573_vm4, %v2811_v0, 0.0 }
0x14b1   : > { %1898 = vadd.xlane.f32.xlu1 %v1897_v4  ;;  %v1894_v7 = vsel %vm573_vm4, %v2813_v2, 0.0 }
0x14b2   : > { %1895 = vadd.xlane.f32.xlu0 %v1894_v7 }
0x14b4   : > { %v2815_v9 = vpop.eup %2814 }
0x14b5   : > { %v2817_v10 = vpop.eup %2816  ;;  %v1903_v11 = vsel %vm573_vm4, %v2815_v9, 0.0 }
0x14b6   : > { %1904 = vadd.xlane.f32.xlu1 %v1903_v11  ;;  %v1900_v12 = vsel %vm573_vm4, %v2817_v10, 0.0 }
0x14b7   : > { %1901 = vadd.xlane.f32.xlu0 %v1900_v12 }
0x14c7   : > { %2758 = vrot.lane.b32.xlu1 %v2757_v13, %s2841_s18  ;;  %v2198_v13 = vsub.s32 2, %v2942_v21 }
0x14cb   : > { %2029 = vrot.lane.b32.xlu1 %v2397_v33, %s2841_s18 }
0x14cd   : > { %1914 = vrot.lane.b32.xlu0 %v1761_v36, %s2840_s17 }
0x14cf   : > { %2110 = vrot.lane.b32.xlu1 %v2948_v28, %s2838_s15  ;;  %v2119_v28 = vsub.s32 1, %v2942_v21 }
0x14d1   : > { %v2120_v7 = vrot.slane %v2826_v8, %v2119_v28 }
0x153e   : > { %v1899_v14 = vpop.xlane.xlu1 %1898 }
0x153f   : > { %2818 = vrcp.f32 %v1899_v14  ;;  %v1896_v15 = vpop.xlane.xlu0 %1895  ;;  %v2199_v14 = vrot.slane %v2826_v8, %v2198_v13 }
0x1540   : > { %2820 = vrcp.f32 %v1896_v15 }
0x1543   : > { %v1905_v19 = vpop.xlane.xlu1 %1904 }
0x1544   : > { %2822 = vrcp.f32 %v1905_v19  ;;  %v1902_v20 = vpop.xlane.xlu0 %1901 }
0x1545   : > { %2824 = vrcp.f32 %v1902_v20 }
0x1547   : > { %v2759_v22 = vpop.permute.xlu1 %2758 }
0x1548   : > { %v2761_v16 = vunpack.i.h.bf16 %v2759_v22  ;;  %v2760_v17 = vunpack.i.l.bf16 %v2759_v22  ;;  %v1915_v18 = vpop.permute.xlu0 %1914 }
0x1549   : > { %v2819_v23 = vpop.eup %2818  ;;  %2626 = vmatprep.subr.mxu0 %v1915_v18 }
0x154a   : > { %v2821_v24 = vpop.eup %2820  ;;  %v2706_v25 = vpack.c.bf16 %v2761_v16, %v2760_v17  ;;  %2627 = vmatpush3.msra.mxu0 %v1915_v18  ;;  %v1911_v27 = vmul.f32 %v2819_v23, %v2811_v0 }
0x154b   : > { %v1910_v26 = vmul.f32 %v2821_v24, %v2813_v2  ;;  %2708 = vmatprep.subr.bf16.mxu0 %v2835_v3  ;;  %v2030_v58 = vpop.permute.xlu1 %2029  ;;  %v282_v2 = vld [vmem:[%s3257_s2 + $0x90] sm:$0xff] }
0x154c   : > { %2707 = vmatpush3.bf16.msra.mxu1 %v2706_v25 }
0x154d   : > { %2628 = vmatprep.mubr.msk.f32.mxu0 %vm573_vm4, %v1910_v26  ;;  %2720 = vmatprep.subr.bf16.mxu1 %v2835_v3 }
0x154e   : > { %v2823_v30 = vpop.eup %2822  ;;  %2629 = vmatmul.mubr.msk.f32.vlgmr.msra.gmra.mrb[18].mxu0 %vm573_vm4, %v1911_v27 }
0x154f   : > { %v2825_v31 = vpop.eup %2824  ;;  %v1913_v32 = vmul.f32 %v2823_v30, %v2815_v9  ;;  %v2111_v1 = vpop.permute.xlu1 %2110 }
0x1550   : > { %v1912_v33 = vmul.f32 %v2825_v31, %v2817_v10 }
0x1552   : > { %2631 = vmatprep.mubr.msk.f32.mxu0 %vm573_vm4, %v1912_v33 }
0x1553   : > { %2632 = vmatmul.mubr.msk.f32.gmra.mrb[20].mxu0 %vm573_vm4, %v1913_v32 }
0x1554   : > { %2657 = vmatprep.mubr.msk.f32.mxu0 %vm2836_vm0, %v2837_v6 }
0x1621   : > { %v2630_v35 = vpop.f32.mrb[18].mxu0 }
0x1622   : > { %v2015_v36 = vmul.f32 %v2630_v35, %v2976_v37  ;;  %v1995_v38 = vpop.f32.mrb[19].mxu0  ;;  %v271_v37 = vld [vmem:[%s3257_s2 + $0x38] sm:$0xff] }
0x1623   : > { %v2014_v40 = vmul.f32 %v1995_v38, %v2967_v34  ;;  %v272_v34 = vld [vmem:[%s3257_s2 + $0x40] sm:$0xff] }
0x1625   : > { %v2018_v41 = vadd.f32 %v2015_v36, %v2014_v40 }
0x1626   : > { %v2633_v43 = vpop.f32.mrb[20].mxu0 }
0x1627   : > { %v2005_v5 = vpop.f32.mrb[21].mxu0  ;;  %v2017_v45 = vmul.f32 %v2633_v43, %v2990_v42  ;;  %v2709_v42 = vpack.c.bf16 %v272_v34, %v271_v37 }
0x1628   : > { %v2016_v44 = vmul.f32 %v2005_v5, %v2982_v39  ;;  %v273_v39 = vld [vmem:[%s3257_s2 + $0x48] sm:$0xff] }
0x1629   : > { %2710 = vmatpush3.bf16.msra.mxu0 %v2709_v42  ;;  %v2712_v49 = vpack.c.bf16 %v274_v48, %v273_v39 }
0x162a   : > { %v2019_v46 = vadd.f32 %v2018_v41, %v2016_v44  ;;  %2711 = vmatprep.subr.bf16.mxu0 %v2835_v3 }
0x162c   : > { %v2020_v47 = vadd.f32 %v2019_v46, %v2017_v45 }
0x162d   : > { %2713 = vmatpush3.bf16.msra.mxu0 %v2712_v49 }
0x162e   : > { %2639 = vmatmul.mubr.msk.f32.vlgmr.msra.gmra.mrb[26].mxu1 %vm387_vm3, %v2020_v47  ;;  %2714 = vmatprep.subr.bf16.mxu0 %v2835_v3 }
0x162f   : > { %2668 = vmatprep.mubr.msk.f32.mxu1 %vm2836_vm0, %v2837_v6  ;;  %v275_v6 = vld [vmem:[%s3257_s2 + $0x58] sm:$0xff]  ;;  %2722 = vmatpush3.bf16.msra.mxu1 %v2721_v57 }
0x1630   : > { %v2715_v51 = vpack.c.bf16 %v276_v50, %v275_v6  ;;  %2723 = vmatprep.subr.bf16.mxu1 %v2835_v3 }
0x1632   : > { %2716 = vmatpush3.bf16.msra.mxu0 %v2715_v51 }
0x1633   : > { %2717 = vmatprep.subr.bf16.mxu0 %v2835_v3  ;;  %v281_v3 = vld [vmem:[%s3257_s2 + $0x88] sm:$0xff] }
0x1634   : > { %v2724_v4 = vpack.c.bf16 %v282_v2, %v281_v3 }
0x1636   : > { %2719 = vmatpush3.bf16.msra.mxu0 %v2718_v54  ;;  %2725 = vmatpush3.bf16.msra.mxu1 %v2724_v4 }
0x1701   : > { %v2101_v59 = vpop.f32.mrb[26].mxu1 }
0x1702   : > { %v2102_v60 = vadd.f32 %v2101_v59, %v2030_v58  ;;  %v2640_v61 = vpop.f32.mrb[27].mxu1 }
0x1704   : > { %2107 = vrot.lane.b32.xlu0 %v2102_v60, %s2838_s15 }
0x1776   : > { %v2108_v29 = vpop.permute.xlu0 %2107 }
0x1777   : > { %v2114_v63 = vsel %vm294_vm1, %v2113_v62, %v2108_v29 }
0x1778   : > { %v2116_v0 = vsel %vm2115_vm5, %v2114_v63, %v2111_v1 }
0x1779   : > { %2658 = vmatmul.mubr.msk.f32.vlgmr.msra.gmra.mrb[22].mxu0 %vm2121_vm6, %v2116_v0 }
0x184c   : > { %v2191_v9 = vpop.f32.mrb[22].mxu0 }
0x184d   : > { %v2192_v10 = vadd.f32 %v2191_v9, %v2120_v7  ;;  %v2659_v11 = vpop.f32.mrb[23].mxu0 }
0x184f   : > { %v2195_v12 = vmax.f32 %v2192_v10, 0.0 }
0x1851   : > { %2669 = vmatmul.mubr.msk.f32.vlgmr.msra.gmra.mrb[28].mxu1 %vm294_vm1, %v2195_v12 }
0x1924   : > { %v2269_v15 = vpop.f32.mrb[28].mxu1 }
0x1925   : > { %v2270_v19 = vadd.f32 %v2269_v15, %v2199_v14  ;;  %v2670_v20 = vpop.f32.mrb[29].mxu1 }
0x1927   : > { %2274 = vst.msk [vmem:[%s263_s24] sm:$0xff] %vm2273_vm7, %v2270_v19 }
0x1928 PF: > { %s16_s21 = sadd.s32 1, %s2833_s21  }
0x1929   : > { %p13_p4 = scmp.ge.s32.totalorder %s16_s21, 6  }
0x192b   :  { %15 = sbr.rel (!%p13_p4) target bundleno = 1 (0x1), region = 83 }

</bundles_post_ra>
